<compile_context>
chip_gen: v5e
topology: v5e:2x2
jax: 0.10.0
libtpu: 0.0.40
codegen_flags: <defaults>
</compile_context>

<pallas_src>
import jax
import jax.numpy as jnp
from jax.experimental import pallas as pl
from jax.experimental.pallas import tpu as pltpu

HIDDEN_SIZE = 32     # H  (nn.GRU hidden size)
OUTPUT_SIZE = 64     # V  (decoder vocab size)

HP = 128             # hidden dim padded to one full lane width
GP = 128             # per-gate lane block (gates at lane offsets 0/128/256)
VP = 128             # vocab padded to one full lane width
TB = 8               # decode steps per grid chunk -> (8,128) dense stores


# --------------------------------------------------------------------------
# Kernel: one grid step == TB DecoderRNN.forward() calls
# --------------------------------------------------------------------------
def _make_kernel(T):
    need_mask = (T % TB) != 0 or T == 0

    def kernel(ids_ref,                                   # scalar prefetch (SMEM)
               h0_ref, emb_ref, wih_ref, whh_ref, bih_ref, bhh_ref,
               wout_ref, bout_ref,
               logp_ref, hout_ref,                        # outputs
               h_scr, x_scr, gi_scr, hist_scr):           # VMEM scratch
        c = pl.program_id(0)
        base = c * TB

        @pl.when(c == 0)
        def _():
            h_scr[...] = h0_ref[...]

        # ---- prologue: gather TB relu'd embedding rows (VMEM-resident table),
        #      then one batched input-gate matmul for the whole chunk.
        for i in range(TB):
            tok = ids_ref[base + i]
            x_scr[pl.ds(i, 1), :] = emb_ref[pl.ds(tok, 1), :]
        gi_scr[...] = (jnp.dot(x_scr[...], wih_ref[...],
                               preferred_element_type=jnp.float32)
                       + bih_ref[...])                    # (TB, 3*GP)

        # ---- recurrence: exactly one (1,HP)x(HP,3*GP) matmul per step.
        h = h_scr[...]                                    # (1, HP), padded lanes 0
        for i in range(TB):
            gi = gi_scr[pl.ds(i, 1), :]                   # (1, 3*GP)
            gh = (jnp.dot(h, whh_ref[...],
                          preferred_element_type=jnp.float32)
                  + bhh_ref[...])                         # (1, 3*GP)
            # PyTorch GRU gate order (r, z, n); each gate one 128-lane block.
            i_r, i_z, i_n = gi[:, 0:GP], gi[:, GP:2 * GP], gi[:, 2 * GP:3 * GP]
            h_r, h_z, h_n = gh[:, 0:GP], gh[:, GP:2 * GP], gh[:, 2 * GP:3 * GP]
            r = jax.nn.sigmoid(i_r + h_r)
            z = jax.nn.sigmoid(i_z + h_z)
            n = jnp.tanh(i_n + r * h_n)                   # b_hn inside r*(...) as in torch
            h_new = (1.0 - z) * n + z * h                 # padded lanes stay exactly 0
            if need_mask:                                 # T not a multiple of TB
                h_new = jnp.where(base + i < T, h_new, h)
            h = h_new
            hist_scr[pl.ds(i, 1), :] = h
        h_scr[...] = h
        hout_ref[...] = h

        # ---- epilogue: batched output head + log-softmax, one dense store.
        logits = (jnp.dot(hist_scr[...], wout_ref[...],
                          preferred_element_type=jnp.float32)
                  + bout_ref[...])                        # (TB, VP)
        lane = jax.lax.broadcasted_iota(jnp.int32, logits.shape, 1)
        logits = jnp.where(lane < OUTPUT_SIZE, logits, jnp.float32(-1e30))
        m = jnp.max(logits, axis=-1, keepdims=True)
        shifted = logits - m
        lse = jnp.log(jnp.sum(jnp.exp(shifted), axis=-1, keepdims=True))
        logp_ref[...] = shifted - lse

    return kernel


# --------------------------------------------------------------------------
# Wrappers
# --------------------------------------------------------------------------
def decoder_rnn_decode(token_ids, hidden0, packed):
    """Run T DecoderRNN.forward() steps fused in one pallas_call.

    token_ids: int32 (T,)   token id fed at each step
    hidden0  : (1, 1, H)    initial hidden state
    returns  : (log_probs (T, V), final_hidden (1, 1, H))
    """
    T = int(token_ids.shape[0])
    num_chunks = max(1, -(-T // TB))
    T_pad = num_chunks * TB

    ids = jnp.zeros((T_pad,), jnp.int32).at[:T].set(token_ids.astype(jnp.int32))
    h0_p = jnp.zeros((1, HP), jnp.float32).at[:, :HIDDEN_SIZE].set(
        hidden0.reshape(1, HIDDEN_SIZE))

    grid_spec = pltpu.PrefetchScalarGridSpec(
        num_scalar_prefetch=1,                         # token_ids -> SMEM
        grid=(num_chunks,),
        in_specs=[
            pl.BlockSpec((1, HP), lambda c, ids: (0, 0)),            # h0
            pl.BlockSpec((OUTPUT_SIZE, HP), lambda c, ids: (0, 0)),  # relu'd embedding
            pl.BlockSpec((HP, 3 * GP), lambda c, ids: (0, 0)),       # W_ih^T (padded)
            pl.BlockSpec((HP, 3 * GP), lambda c, ids: (0, 0)),       # W_hh^T (padded)
            pl.BlockSpec((1, 3 * GP), lambda c, ids: (0, 0)),        # b_ih
            pl.BlockSpec((1, 3 * GP), lambda c, ids: (0, 0)),        # b_hh
            pl.BlockSpec((HP, VP), lambda c, ids: (0, 0)),           # W_out^T (padded)
            pl.BlockSpec((1, VP), lambda c, ids: (0, 0)),            # b_out
        ],
        out_specs=(
            pl.BlockSpec((TB, VP), lambda c, ids: (c, 0)),           # chunk log-probs
            pl.BlockSpec((1, HP), lambda c, ids: (0, 0)),            # final hidden
        ),
        scratch_shapes=[
            pltpu.VMEM((1, HP), jnp.float32),          # hidden carry
            pltpu.VMEM((TB, HP), jnp.float32),         # gathered embeddings
            pltpu.VMEM((TB, 3 * GP), jnp.float32),     # batched input gates
            pltpu.VMEM((TB, HP), jnp.float32),         # per-step hidden history
        ],
    )

    logp_p, h_p = pl.pallas_call(
        _make_kernel(T),
        out_shape=(
            jax.ShapeDtypeStruct((T_pad, VP), jnp.float32),
            jax.ShapeDtypeStruct((1, HP), jnp.float32),
        ),
        grid_spec=grid_spec,
        compiler_params=pltpu.CompilerParams(
            dimension_semantics=("arbitrary",)),       # time carries the hidden state
    )(
        ids,
        h0_p, packed["embedding"],
        packed["w_ih"], packed["w_hh"], packed["b_ih"], packed["b_hh"],
        packed["w_out"], packed["b_out"],
    )

    log_probs = logp_p[:T, :OUTPUT_SIZE]
    new_hidden = h_p[:, :HIDDEN_SIZE].reshape(1, 1, HIDDEN_SIZE)
    return log_probs, new_hidden


def decoder_rnn_forward(token, hidden, packed):
    """Single-step forward matching DecoderRNN.forward(input, hidden)."""
    tok = jnp.reshape(token, (1,)).astype(jnp.int32)
    logp, new_hidden = decoder_rnn_decode(tok, hidden, packed)
    return logp, new_hidden


# --------------------------------------------------------------------------
# Parameters (PyTorch layout) and lane-padded packing for the kernel
# --------------------------------------------------------------------------
def init_params(key, hidden_size, output_size):
    H, V = hidden_size, output_size
    ks = jax.random.split(key, 7)
    scale = 1.0 / jnp.sqrt(H)
    return {
        "embedding": jax.random.normal(ks[0], (V, H), jnp.float32),
        "w_ih": jax.random.uniform(ks[1], (3 * H, H), jnp.float32, -scale, scale),
        "w_hh": jax.random.uniform(ks[2], (3 * H, H), jnp.float32, -scale, scale),
        "b_ih": jax.random.uniform(ks[3], (3 * H,), jnp.float32, -scale, scale),
        "b_hh": jax.random.uniform(ks[4], (3 * H,), jnp.float32, -scale, scale),
        "w_out": jax.random.uniform(ks[5], (V, H), jnp.float32, -scale, scale),
        "b_out": jax.random.uniform(ks[6], (V,), jnp.float32, -scale, scale),
    }


def pack_params(p):
    """Transpose + zero-pad to lane-aligned kernel layout; fold ReLU into table."""
    H, V = HIDDEN_SIZE, OUTPUT_SIZE

    # F.relu(embedding(x)) == relu applied to the table rows -> precompute once.
    emb = jnp.zeros((V, HP), jnp.float32).at[:, :H].set(
        jnp.maximum(p["embedding"], 0.0))

    def pack_w(w):                      # (3H, H) torch -> (HP, 3*GP), gates @ 0/128/256
        out = jnp.zeros((HP, 3 * GP), jnp.float32)
        for g in range(3):
            out = out.at[:H, g * GP:g * GP + H].set(w[g * H:(g + 1) * H, :].T)
        return out

    def pack_b(b):                      # (3H,) -> (1, 3*GP)
        out = jnp.zeros((1, 3 * GP), jnp.float32)
        for g in range(3):
            out = out.at[0, g * GP:g * GP + H].set(b[g * H:(g + 1) * H])
        return out

    w_out = jnp.zeros((HP, VP), jnp.float32).at[:H, :V].set(p["w_out"].T)
    b_out = jnp.zeros((1, VP), jnp.float32).at[0, :V].set(p["b_out"])

    return {
        "embedding": emb,
        "w_ih": pack_w(p["w_ih"]), "w_hh": pack_w(p["w_hh"]),
        "b_ih": pack_b(p["b_ih"]), "b_hh": pack_b(p["b_hh"]),
        "w_out": w_out, "b_out": b_out,
    }


# --------------------------------------------------------------------------
# Pure-JAX reference (mirrors the PyTorch module, stepped T times)
# --------------------------------------------------------------------------
def reference_decode(token_ids, hidden0, p):
    H = HIDDEN_SIZE
    hi = jax.lax.Precision.HIGHEST
    h = hidden0.reshape(1, H)
    outs = []
    for t in range(int(token_ids.shape[0])):
        x = jnp.maximum(p["embedding"][token_ids[t]].reshape(1, H), 0.0)
        gi = jnp.dot(x, p["w_ih"].T, precision=hi) + p["b_ih"]
        gh = jnp.dot(h, p["w_hh"].T, precision=hi) + p["b_hh"]
        i_r, i_z, i_n = jnp.split(gi, 3, axis=1)
        h_r, h_z, h_n = jnp.split(gh, 3, axis=1)
        r = jax.nn.sigmoid(i_r + h_r)
        z = jax.nn.sigmoid(i_z + h_z)
        n = jnp.tanh(i_n + r * h_n)
        h = (1.0 - z) * n + z * h
        logits = jnp.dot(h, p["w_out"].T, precision=hi) + p["b_out"]
        outs.append(jax.nn.log_softmax(logits, axis=-1))
    return jnp.concatenate(outs, axis=0), h.reshape(1, 1, H)


if __name__ == "__main__":
    key = jax.random.PRNGKey(0)
    params = init_params(key, HIDDEN_SIZE, OUTPUT_SIZE)
    packed = pack_params(params)

    T = 8
    token_ids = jax.random.randint(jax.random.PRNGKey(1), (T,), 0, OUTPUT_SIZE,
                                   dtype=jnp.int32)
    hidden0 = jnp.zeros((1, 1, HIDDEN_SIZE), jnp.float32)

    # Fused T-step decode (the optimized path)
    log_probs, new_hidden = jax.jit(decoder_rnn_decode)(token_ids, hidden0, packed)
    jax.block_until_ready((log_probs, new_hidden))

    ref_logp, ref_h = reference_decode(token_ids, hidden0, params)

    assert log_probs.shape == (T, OUTPUT_SIZE)
    assert new_hidden.shape == (1, 1, HIDDEN_SIZE)
    assert bool(jnp.allclose(jnp.sum(jnp.exp(log_probs), axis=-1), 1.0, atol=1e-3))
    # Kernel matmuls use DEFAULT MXU precision (single bf16 pass, f32 accum) vs.
    # HIGHEST in the reference -> tolerances relaxed vs. the bit-exact version.
    assert bool(jnp.allclose(log_probs, ref_logp, atol=2e-2, rtol=2e-2))
    assert bool(jnp.allclose(new_hidden, ref_h, atol=2e-2, rtol=2e-2))

    # Single-step forward (original nn.Module signature)
    tok0 = jnp.array([[int(token_ids[0])]], dtype=jnp.int32)
    lp1, h1 = jax.jit(decoder_rnn_forward)(tok0, hidden0, packed)
    jax.block_until_ready((lp1, h1))
    assert lp1.shape == (1, OUTPUT_SIZE) and h1.shape == (1, 1, HIDDEN_SIZE)
    assert bool(jnp.allclose(lp1, ref_logp[:1], atol=2e-2, rtol=2e-2))

    print("KERNEL_OK")
</pallas_src>

<mosaic_0001>
module attributes {stable_mosaic.version = 11 : i64} {
  func.func @kernel(%arg0: i32, %arg1: memref<8xi32, #tpu.memory_space<smem>>, %arg2: memref<1x128xf32, #tpu.memory_space<vmem>>, %arg3: memref<64x128xf32, #tpu.memory_space<vmem>>, %arg4: memref<128x384xf32, #tpu.memory_space<vmem>>, %arg5: memref<128x384xf32, #tpu.memory_space<vmem>>, %arg6: memref<1x384xf32, #tpu.memory_space<vmem>>, %arg7: memref<1x384xf32, #tpu.memory_space<vmem>>, %arg8: memref<128x128xf32, #tpu.memory_space<vmem>>, %arg9: memref<1x128xf32, #tpu.memory_space<vmem>>, %arg10: memref<8x128xf32, #tpu.memory_space<vmem>>, %arg11: memref<1x128xf32, #tpu.memory_space<vmem>>, %arg12: memref<1x128xf32, #tpu.memory_space<vmem>>, %arg13: memref<8x128xf32, #tpu.memory_space<vmem>>, %arg14: memref<8x384xf32, #tpu.memory_space<vmem>>, %arg15: memref<8x128xf32, #tpu.memory_space<vmem>>) attributes {dimension_semantics = [#tpu.dimension_semantics<arbitrary>], iteration_bounds = array<i64: 1>, scalar_prefetch = 1 : i64, scratch_operands = 4 : i64, tpu.core_type = #tpu.core_type<tc>, window_params = [{pipeline_mode = #tpu.pipeline_mode<synchronous>, transform_indices = @transform_0, window_bounds = array<i64: 1, 128>}, {pipeline_mode = #tpu.pipeline_mode<synchronous>, transform_indices = @transform_1, window_bounds = array<i64: 64, 128>}, {pipeline_mode = #tpu.pipeline_mode<synchronous>, transform_indices = @transform_2, window_bounds = array<i64: 128, 384>}, {pipeline_mode = #tpu.pipeline_mode<synchronous>, transform_indices = @transform_3, window_bounds = array<i64: 128, 384>}, {pipeline_mode = #tpu.pipeline_mode<synchronous>, transform_indices = @transform_4, window_bounds = array<i64: 1, 384>}, {pipeline_mode = #tpu.pipeline_mode<synchronous>, transform_indices = @transform_5, window_bounds = array<i64: 1, 384>}, {pipeline_mode = #tpu.pipeline_mode<synchronous>, transform_indices = @transform_6, window_bounds = array<i64: 128, 128>}, {pipeline_mode = #tpu.pipeline_mode<synchronous>, transform_indices = @transform_7, window_bounds = array<i64: 1, 128>}, {transform_indices = @transform_8, window_bounds = array<i64: 8, 128>}, {pipeline_mode = #tpu.pipeline_mode<synchronous>, transform_indices = @transform_9, window_bounds = array<i64: 1, 128>}]} {
    %c8_i32 = arith.constant 8 : i32
    %0 = arith.muli %arg0, %c8_i32 : i32
    %c0_i32 = arith.constant 0 : i32
    %1 = arith.cmpi eq, %arg0, %c0_i32 : i32
    %2 = arith.extui %1 : i1 to i32
    %c0_i32_0 = arith.constant 0 : i32
    %3 = arith.cmpi ne, %2, %c0_i32_0 : i32
    scf.if %3 {
      %c0_140 = arith.constant 0 : index
      %c0_141 = arith.constant 0 : index
      %340 = vector.load %arg2[%c0_140, %c0_141] : memref<1x128xf32, #tpu.memory_space<vmem>>, vector<1x128xf32>
      %c0_142 = arith.constant 0 : index
      %c0_143 = arith.constant 0 : index
      %341 = vector.load %arg12[%c0_142, %c0_143] : memref<1x128xf32, #tpu.memory_space<vmem>>, vector<1x128xf32>
      tpu.vector_store %arg12[%c0_142, %c0_143], %340 {strides = array<i32>} : memref<1x128xf32, #tpu.memory_space<vmem>>, vector<1x128xf32>,
    } else {
    }
    %c0_i32_1 = arith.constant 0 : i32
    %4 = arith.addi %0, %c0_i32_1 : i32
    %5 = arith.index_cast %4 : i32 to index
    %6 = memref.load %arg1[%5] : memref<8xi32, #tpu.memory_space<smem>>
    %7 = arith.index_cast %6 : i32 to index
    %c0 = arith.constant 0 : index
    %8 = vector.load %arg3[%7, %c0] : memref<64x128xf32, #tpu.memory_space<vmem>>, vector<1x128xf32>
    %c0_2 = arith.constant 0 : index
    %c0_3 = arith.constant 0 : index
    %9 = vector.load %arg13[%c0_2, %c0_3] : memref<8x128xf32, #tpu.memory_space<vmem>>, vector<1x128xf32>
    tpu.vector_store %arg13[%c0_2, %c0_3], %8 {strides = array<i32>} : memref<8x128xf32, #tpu.memory_space<vmem>>, vector<1x128xf32>,
    %c1_i32 = arith.constant 1 : i32
    %10 = arith.addi %0, %c1_i32 : i32
    %11 = arith.index_cast %10 : i32 to index
    %12 = memref.load %arg1[%11] : memref<8xi32, #tpu.memory_space<smem>>
    %13 = arith.index_cast %12 : i32 to index
    %c0_4 = arith.constant 0 : index
    %14 = vector.load %arg3[%13, %c0_4] : memref<64x128xf32, #tpu.memory_space<vmem>>, vector<1x128xf32>
    %c1 = arith.constant 1 : index
    %c0_5 = arith.constant 0 : index
    %15 = vector.load %arg13[%c1, %c0_5] : memref<8x128xf32, #tpu.memory_space<vmem>>, vector<1x128xf32>
    tpu.vector_store %arg13[%c1, %c0_5], %14 {strides = array<i32>} : memref<8x128xf32, #tpu.memory_space<vmem>>, vector<1x128xf32>,
    %c2_i32 = arith.constant 2 : i32
    %16 = arith.addi %0, %c2_i32 : i32
    %17 = arith.index_cast %16 : i32 to index
    %18 = memref.load %arg1[%17] : memref<8xi32, #tpu.memory_space<smem>>
    %19 = arith.index_cast %18 : i32 to index
    %c0_6 = arith.constant 0 : index
    %20 = vector.load %arg3[%19, %c0_6] : memref<64x128xf32, #tpu.memory_space<vmem>>, vector<1x128xf32>
    %c2 = arith.constant 2 : index
    %c0_7 = arith.constant 0 : index
    %21 = vector.load %arg13[%c2, %c0_7] : memref<8x128xf32, #tpu.memory_space<vmem>>, vector<1x128xf32>
    tpu.vector_store %arg13[%c2, %c0_7], %20 {strides = array<i32>} : memref<8x128xf32, #tpu.memory_space<vmem>>, vector<1x128xf32>,
    %c3_i32 = arith.constant 3 : i32
    %22 = arith.addi %0, %c3_i32 : i32
    %23 = arith.index_cast %22 : i32 to index
    %24 = memref.load %arg1[%23] : memref<8xi32, #tpu.memory_space<smem>>
    %25 = arith.index_cast %24 : i32 to index
    %c0_8 = arith.constant 0 : index
    %26 = vector.load %arg3[%25, %c0_8] : memref<64x128xf32, #tpu.memory_space<vmem>>, vector<1x128xf32>
    %c3 = arith.constant 3 : index
    %c0_9 = arith.constant 0 : index
    %27 = vector.load %arg13[%c3, %c0_9] : memref<8x128xf32, #tpu.memory_space<vmem>>, vector<1x128xf32>
    tpu.vector_store %arg13[%c3, %c0_9], %26 {strides = array<i32>} : memref<8x128xf32, #tpu.memory_space<vmem>>, vector<1x128xf32>,
    %c4_i32 = arith.constant 4 : i32
    %28 = arith.addi %0, %c4_i32 : i32
    %29 = arith.index_cast %28 : i32 to index
    %30 = memref.load %arg1[%29] : memref<8xi32, #tpu.memory_space<smem>>
    %31 = arith.index_cast %30 : i32 to index
    %c0_10 = arith.constant 0 : index
    %32 = vector.load %arg3[%31, %c0_10] : memref<64x128xf32, #tpu.memory_space<vmem>>, vector<1x128xf32>
    %c4 = arith.constant 4 : index
    %c0_11 = arith.constant 0 : index
    %33 = vector.load %arg13[%c4, %c0_11] : memref<8x128xf32, #tpu.memory_space<vmem>>, vector<1x128xf32>
    tpu.vector_store %arg13[%c4, %c0_11], %32 {strides = array<i32>} : memref<8x128xf32, #tpu.memory_space<vmem>>, vector<1x128xf32>,
    %c5_i32 = arith.constant 5 : i32
    %34 = arith.addi %0, %c5_i32 : i32
    %35 = arith.index_cast %34 : i32 to index
    %36 = memref.load %arg1[%35] : memref<8xi32, #tpu.memory_space<smem>>
    %37 = arith.index_cast %36 : i32 to index
    %c0_12 = arith.constant 0 : index
    %38 = vector.load %arg3[%37, %c0_12] : memref<64x128xf32, #tpu.memory_space<vmem>>, vector<1x128xf32>
    %c5 = arith.constant 5 : index
    %c0_13 = arith.constant 0 : index
    %39 = vector.load %arg13[%c5, %c0_13] : memref<8x128xf32, #tpu.memory_space<vmem>>, vector<1x128xf32>
    tpu.vector_store %arg13[%c5, %c0_13], %38 {strides = array<i32>} : memref<8x128xf32, #tpu.memory_space<vmem>>, vector<1x128xf32>,
    %c6_i32 = arith.constant 6 : i32
    %40 = arith.addi %0, %c6_i32 : i32
    %41 = arith.index_cast %40 : i32 to index
    %42 = memref.load %arg1[%41] : memref<8xi32, #tpu.memory_space<smem>>
    %43 = arith.index_cast %42 : i32 to index
    %c0_14 = arith.constant 0 : index
    %44 = vector.load %arg3[%43, %c0_14] : memref<64x128xf32, #tpu.memory_space<vmem>>, vector<1x128xf32>
    %c6 = arith.constant 6 : index
    %c0_15 = arith.constant 0 : index
    %45 = vector.load %arg13[%c6, %c0_15] : memref<8x128xf32, #tpu.memory_space<vmem>>, vector<1x128xf32>
    tpu.vector_store %arg13[%c6, %c0_15], %44 {strides = array<i32>} : memref<8x128xf32, #tpu.memory_space<vmem>>, vector<1x128xf32>,
    %c7_i32 = arith.constant 7 : i32
    %46 = arith.addi %0, %c7_i32 : i32
    %47 = arith.index_cast %46 : i32 to index
    %48 = memref.load %arg1[%47] : memref<8xi32, #tpu.memory_space<smem>>
    %49 = arith.index_cast %48 : i32 to index
    %c0_16 = arith.constant 0 : index
    %50 = vector.load %arg3[%49, %c0_16] : memref<64x128xf32, #tpu.memory_space<vmem>>, vector<1x128xf32>
    %c7 = arith.constant 7 : index
    %c0_17 = arith.constant 0 : index
    %51 = vector.load %arg13[%c7, %c0_17] : memref<8x128xf32, #tpu.memory_space<vmem>>, vector<1x128xf32>
    tpu.vector_store %arg13[%c7, %c0_17], %50 {strides = array<i32>} : memref<8x128xf32, #tpu.memory_space<vmem>>, vector<1x128xf32>,
    %c0_18 = arith.constant 0 : index
    %c0_19 = arith.constant 0 : index
    %52 = vector.load %arg13[%c0_18, %c0_19] : memref<8x128xf32, #tpu.memory_space<vmem>>, vector<8x128xf32>
    %c0_20 = arith.constant 0 : index
    %c0_21 = arith.constant 0 : index
    %53 = vector.load %arg4[%c0_20, %c0_21] : memref<128x384xf32, #tpu.memory_space<vmem>>, vector<128x384xf32>
    %cst = arith.constant dense<0.000000e+00> : vector<8x384xf32>
    %54 = tpu.matmul %52, %53, %cst {dimension_numbers = #tpu.dot_dimension_numbers<[1], [0], [0], [1], [0, 0, 1, 1], [], []>} : vector<8x128xf32>, vector<128x384xf32>, vector<8x384xf32> -> vector<8x384xf32>
    %c0_22 = arith.constant 0 : index
    %c0_23 = arith.constant 0 : index
    %55 = vector.load %arg6[%c0_22, %c0_23] : memref<1x384xf32, #tpu.memory_space<vmem>>, vector<1x384xf32>
    %56 = vector.broadcast %55 : vector<1x384xf32> to vector<8x384xf32>
    %57 = arith.addf %54, %56 : vector<8x384xf32>
    %c0_24 = arith.constant 0 : index
    %c0_25 = arith.constant 0 : index
    %58 = vector.load %arg14[%c0_24, %c0_25] : memref<8x384xf32, #tpu.memory_space<vmem>>, vector<8x384xf32>
    tpu.vector_store %arg14[%c0_24, %c0_25], %57 {strides = array<i32>} : memref<8x384xf32, #tpu.memory_space<vmem>>, vector<8x384xf32>,
    %c0_26 = arith.constant 0 : index
    %c0_27 = arith.constant 0 : index
    %59 = vector.load %arg12[%c0_26, %c0_27] : memref<1x128xf32, #tpu.memory_space<vmem>>, vector<1x128xf32>
    %c0_28 = arith.constant 0 : index
    %c0_29 = arith.constant 0 : index
    %60 = vector.load %arg14[%c0_28, %c0_29] : memref<8x384xf32, #tpu.memory_space<vmem>>, vector<1x384xf32>
    %c0_30 = arith.constant 0 : index
    %c0_31 = arith.constant 0 : index
    %61 = vector.load %arg5[%c0_30, %c0_31] : memref<128x384xf32, #tpu.memory_space<vmem>>, vector<128x384xf32>
    %cst_32 = arith.constant dense<0.000000e+00> : vector<1x384xf32>
    %62 = tpu.matmul %59, %61, %cst_32 {dimension_numbers = #tpu.dot_dimension_numbers<[1], [0], [0], [1], [0, 0, 1, 1], [], []>} : vector<1x128xf32>, vector<128x384xf32>, vector<1x384xf32> -> vector<1x384xf32>
    %c0_33 = arith.constant 0 : index
    %c0_34 = arith.constant 0 : index
    %63 = vector.load %arg7[%c0_33, %c0_34] : memref<1x384xf32, #tpu.memory_space<vmem>>, vector<1x384xf32>
    %64 = arith.addf %62, %63 : vector<1x384xf32>
    %65 = vector.extract_strided_slice %60 {offsets = [0, 0], sizes = [1, 128], strides = [1, 1]} : vector<1x384xf32> to vector<1x128xf32>
    %66 = vector.extract_strided_slice %60 {offsets = [0, 128], sizes = [1, 128], strides = [1, 1]} : vector<1x384xf32> to vector<1x128xf32>
    %67 = vector.extract_strided_slice %60 {offsets = [0, 256], sizes = [1, 128], strides = [1, 1]} : vector<1x384xf32> to vector<1x128xf32>
    %68 = vector.extract_strided_slice %64 {offsets = [0, 0], sizes = [1, 128], strides = [1, 1]} : vector<1x384xf32> to vector<1x128xf32>
    %69 = vector.extract_strided_slice %64 {offsets = [0, 128], sizes = [1, 128], strides = [1, 1]} : vector<1x384xf32> to vector<1x128xf32>
    %70 = vector.extract_strided_slice %64 {offsets = [0, 256], sizes = [1, 128], strides = [1, 1]} : vector<1x384xf32> to vector<1x128xf32>
    %71 = arith.addf %65, %68 : vector<1x128xf32>
    %72 = arith.negf %71 : vector<1x128xf32>
    %73 = math.exp %72 : vector<1x128xf32>
    %cst_35 = arith.constant 1.000000e+00 : f32
    %74 = vector.broadcast %cst_35 : f32 to vector<1x128xf32>
    %75 = arith.addf %74, %73 : vector<1x128xf32>
    %76 = arith.divf %74, %75 : vector<1x128xf32>
    %77 = arith.addf %66, %69 : vector<1x128xf32>
    %78 = arith.negf %77 : vector<1x128xf32>
    %79 = math.exp %78 : vector<1x128xf32>
    %cst_36 = arith.constant 1.000000e+00 : f32
    %80 = vector.broadcast %cst_36 : f32 to vector<1x128xf32>
    %81 = arith.addf %80, %79 : vector<1x128xf32>
    %82 = arith.divf %80, %81 : vector<1x128xf32>
    %83 = arith.mulf %76, %70 : vector<1x128xf32>
    %84 = arith.addf %67, %83 : vector<1x128xf32>
    %85 = math.tanh %84 : vector<1x128xf32>
    %cst_37 = arith.constant 1.000000e+00 : f32
    %86 = vector.broadcast %cst_37 : f32 to vector<1x128xf32>
    %87 = arith.subf %86, %82 : vector<1x128xf32>
    %88 = arith.mulf %87, %85 : vector<1x128xf32>
    %89 = arith.mulf %82, %59 : vector<1x128xf32>
    %90 = arith.addf %88, %89 : vector<1x128xf32>
    %c0_38 = arith.constant 0 : index
    %c0_39 = arith.constant 0 : index
    %91 = vector.load %arg15[%c0_38, %c0_39] : memref<8x128xf32, #tpu.memory_space<vmem>>, vector<1x128xf32>
    tpu.vector_store %arg15[%c0_38, %c0_39], %90 {strides = array<i32>} : memref<8x128xf32, #tpu.memory_space<vmem>>, vector<1x128xf32>,
    %c1_40 = arith.constant 1 : index
    %c0_41 = arith.constant 0 : index
    %92 = vector.load %arg14[%c1_40, %c0_41] : memref<8x384xf32, #tpu.memory_space<vmem>>, vector<1x384xf32>
    %c0_42 = arith.constant 0 : index
    %c0_43 = arith.constant 0 : index
    %93 = vector.load %arg5[%c0_42, %c0_43] : memref<128x384xf32, #tpu.memory_space<vmem>>, vector<128x384xf32>
    %cst_44 = arith.constant dense<0.000000e+00> : vector<1x384xf32>
    %94 = tpu.matmul %90, %93, %cst_44 {dimension_numbers = #tpu.dot_dimension_numbers<[1], [0], [0], [1], [0, 0, 1, 1], [], []>} : vector<1x128xf32>, vector<128x384xf32>, vector<1x384xf32> -> vector<1x384xf32>
    %c0_45 = arith.constant 0 : index
    %c0_46 = arith.constant 0 : index
    %95 = vector.load %arg7[%c0_45, %c0_46] : memref<1x384xf32, #tpu.memory_space<vmem>>, vector<1x384xf32>
    %96 = arith.addf %94, %95 : vector<1x384xf32>
    %97 = vector.extract_strided_slice %92 {offsets = [0, 0], sizes = [1, 128], strides = [1, 1]} : vector<1x384xf32> to vector<1x128xf32>
    %98 = vector.extract_strided_slice %92 {offsets = [0, 128], sizes = [1, 128], strides = [1, 1]} : vector<1x384xf32> to vector<1x128xf32>
    %99 = vector.extract_strided_slice %92 {offsets = [0, 256], sizes = [1, 128], strides = [1, 1]} : vector<1x384xf32> to vector<1x128xf32>
    %100 = vector.extract_strided_slice %96 {offsets = [0, 0], sizes = [1, 128], strides = [1, 1]} : vector<1x384xf32> to vector<1x128xf32>
    %101 = vector.extract_strided_slice %96 {offsets = [0, 128], sizes = [1, 128], strides = [1, 1]} : vector<1x384xf32> to vector<1x128xf32>
    %102 = vector.extract_strided_slice %96 {offsets = [0, 256], sizes = [1, 128], strides = [1, 1]} : vector<1x384xf32> to vector<1x128xf32>
    %103 = arith.addf %97, %100 : vector<1x128xf32>
    %104 = arith.negf %103 : vector<1x128xf32>
    %105 = math.exp %104 : vector<1x128xf32>
    %cst_47 = arith.constant 1.000000e+00 : f32
    %106 = vector.broadcast %cst_47 : f32 to vector<1x128xf32>
    %107 = arith.addf %106, %105 : vector<1x128xf32>
    %108 = arith.divf %106, %107 : vector<1x128xf32>
    %109 = arith.addf %98, %101 : vector<1x128xf32>
    %110 = arith.negf %109 : vector<1x128xf32>
    %111 = math.exp %110 : vector<1x128xf32>
    %cst_48 = arith.constant 1.000000e+00 : f32
    %112 = vector.broadcast %cst_48 : f32 to vector<1x128xf32>
    %113 = arith.addf %112, %111 : vector<1x128xf32>
    %114 = arith.divf %112, %113 : vector<1x128xf32>
    %115 = arith.mulf %108, %102 : vector<1x128xf32>
    %116 = arith.addf %99, %115 : vector<1x128xf32>
    %117 = math.tanh %116 : vector<1x128xf32>
    %cst_49 = arith.constant 1.000000e+00 : f32
    %118 = vector.broadcast %cst_49 : f32 to vector<1x128xf32>
    %119 = arith.subf %118, %114 : vector<1x128xf32>
    %120 = arith.mulf %119, %117 : vector<1x128xf32>
    %121 = arith.mulf %114, %90 : vector<1x128xf32>
    %122 = arith.addf %120, %121 : vector<1x128xf32>
    %c1_50 = arith.constant 1 : index
    %c0_51 = arith.constant 0 : index
    %123 = vector.load %arg15[%c1_50, %c0_51] : memref<8x128xf32, #tpu.memory_space<vmem>>, vector<1x128xf32>
    tpu.vector_store %arg15[%c1_50, %c0_51], %122 {strides = array<i32>} : memref<8x128xf32, #tpu.memory_space<vmem>>, vector<1x128xf32>,
    %c2_52 = arith.constant 2 : index
    %c0_53 = arith.constant 0 : index
    %124 = vector.load %arg14[%c2_52, %c0_53] : memref<8x384xf32, #tpu.memory_space<vmem>>, vector<1x384xf32>
    %c0_54 = arith.constant 0 : index
    %c0_55 = arith.constant 0 : index
    %125 = vector.load %arg5[%c0_54, %c0_55] : memref<128x384xf32, #tpu.memory_space<vmem>>, vector<128x384xf32>
    %cst_56 = arith.constant dense<0.000000e+00> : vector<1x384xf32>
    %126 = tpu.matmul %122, %125, %cst_56 {dimension_numbers = #tpu.dot_dimension_numbers<[1], [0], [0], [1], [0, 0, 1, 1], [], []>} : vector<1x128xf32>, vector<128x384xf32>, vector<1x384xf32> -> vector<1x384xf32>
    %c0_57 = arith.constant 0 : index
    %c0_58 = arith.constant 0 : index
    %127 = vector.load %arg7[%c0_57, %c0_58] : memref<1x384xf32, #tpu.memory_space<vmem>>, vector<1x384xf32>
    %128 = arith.addf %126, %127 : vector<1x384xf32>
    %129 = vector.extract_strided_slice %124 {offsets = [0, 0], sizes = [1, 128], strides = [1, 1]} : vector<1x384xf32> to vector<1x128xf32>
    %130 = vector.extract_strided_slice %124 {offsets = [0, 128], sizes = [1, 128], strides = [1, 1]} : vector<1x384xf32> to vector<1x128xf32>
    %131 = vector.extract_strided_slice %124 {offsets = [0, 256], sizes = [1, 128], strides = [1, 1]} : vector<1x384xf32> to vector<1x128xf32>
    %132 = vector.extract_strided_slice %128 {offsets = [0, 0], sizes = [1, 128], strides = [1, 1]} : vector<1x384xf32> to vector<1x128xf32>
    %133 = vector.extract_strided_slice %128 {offsets = [0, 128], sizes = [1, 128], strides = [1, 1]} : vector<1x384xf32> to vector<1x128xf32>
    %134 = vector.extract_strided_slice %128 {offsets = [0, 256], sizes = [1, 128], strides = [1, 1]} : vector<1x384xf32> to vector<1x128xf32>
    %135 = arith.addf %129, %132 : vector<1x128xf32>
    %136 = arith.negf %135 : vector<1x128xf32>
    %137 = math.exp %136 : vector<1x128xf32>
    %cst_59 = arith.constant 1.000000e+00 : f32
    %138 = vector.broadcast %cst_59 : f32 to vector<1x128xf32>
    %139 = arith.addf %138, %137 : vector<1x128xf32>
    %140 = arith.divf %138, %139 : vector<1x128xf32>
    %141 = arith.addf %130, %133 : vector<1x128xf32>
    %142 = arith.negf %141 : vector<1x128xf32>
    %143 = math.exp %142 : vector<1x128xf32>
    %cst_60 = arith.constant 1.000000e+00 : f32
    %144 = vector.broadcast %cst_60 : f32 to vector<1x128xf32>
    %145 = arith.addf %144, %143 : vector<1x128xf32>
    %146 = arith.divf %144, %145 : vector<1x128xf32>
    %147 = arith.mulf %140, %134 : vector<1x128xf32>
    %148 = arith.addf %131, %147 : vector<1x128xf32>
    %149 = math.tanh %148 : vector<1x128xf32>
    %cst_61 = arith.constant 1.000000e+00 : f32
    %150 = vector.broadcast %cst_61 : f32 to vector<1x128xf32>
    %151 = arith.subf %150, %146 : vector<1x128xf32>
    %152 = arith.mulf %151, %149 : vector<1x128xf32>
    %153 = arith.mulf %146, %122 : vector<1x128xf32>
    %154 = arith.addf %152, %153 : vector<1x128xf32>
    %c2_62 = arith.constant 2 : index
    %c0_63 = arith.constant 0 : index
    %155 = vector.load %arg15[%c2_62, %c0_63] : memref<8x128xf32, #tpu.memory_space<vmem>>, vector<1x128xf32>
    tpu.vector_store %arg15[%c2_62, %c0_63], %154 {strides = array<i32>} : memref<8x128xf32, #tpu.memory_space<vmem>>, vector<1x128xf32>,
    %c3_64 = arith.constant 3 : index
    %c0_65 = arith.constant 0 : index
    %156 = vector.load %arg14[%c3_64, %c0_65] : memref<8x384xf32, #tpu.memory_space<vmem>>, vector<1x384xf32>
    %c0_66 = arith.constant 0 : index
    %c0_67 = arith.constant 0 : index
    %157 = vector.load %arg5[%c0_66, %c0_67] : memref<128x384xf32, #tpu.memory_space<vmem>>, vector<128x384xf32>
    %cst_68 = arith.constant dense<0.000000e+00> : vector<1x384xf32>
    %158 = tpu.matmul %154, %157, %cst_68 {dimension_numbers = #tpu.dot_dimension_numbers<[1], [0], [0], [1], [0, 0, 1, 1], [], []>} : vector<1x128xf32>, vector<128x384xf32>, vector<1x384xf32> -> vector<1x384xf32>
    %c0_69 = arith.constant 0 : index
    %c0_70 = arith.constant 0 : index
    %159 = vector.load %arg7[%c0_69, %c0_70] : memref<1x384xf32, #tpu.memory_space<vmem>>, vector<1x384xf32>
    %160 = arith.addf %158, %159 : vector<1x384xf32>
    %161 = vector.extract_strided_slice %156 {offsets = [0, 0], sizes = [1, 128], strides = [1, 1]} : vector<1x384xf32> to vector<1x128xf32>
    %162 = vector.extract_strided_slice %156 {offsets = [0, 128], sizes = [1, 128], strides = [1, 1]} : vector<1x384xf32> to vector<1x128xf32>
    %163 = vector.extract_strided_slice %156 {offsets = [0, 256], sizes = [1, 128], strides = [1, 1]} : vector<1x384xf32> to vector<1x128xf32>
    %164 = vector.extract_strided_slice %160 {offsets = [0, 0], sizes = [1, 128], strides = [1, 1]} : vector<1x384xf32> to vector<1x128xf32>
    %165 = vector.extract_strided_slice %160 {offsets = [0, 128], sizes = [1, 128], strides = [1, 1]} : vector<1x384xf32> to vector<1x128xf32>
    %166 = vector.extract_strided_slice %160 {offsets = [0, 256], sizes = [1, 128], strides = [1, 1]} : vector<1x384xf32> to vector<1x128xf32>
    %167 = arith.addf %161, %164 : vector<1x128xf32>
    %168 = arith.negf %167 : vector<1x128xf32>
    %169 = math.exp %168 : vector<1x128xf32>
    %cst_71 = arith.constant 1.000000e+00 : f32
    %170 = vector.broadcast %cst_71 : f32 to vector<1x128xf32>
    %171 = arith.addf %170, %169 : vector<1x128xf32>
    %172 = arith.divf %170, %171 : vector<1x128xf32>
    %173 = arith.addf %162, %165 : vector<1x128xf32>
    %174 = arith.negf %173 : vector<1x128xf32>
    %175 = math.exp %174 : vector<1x128xf32>
    %cst_72 = arith.constant 1.000000e+00 : f32
    %176 = vector.broadcast %cst_72 : f32 to vector<1x128xf32>
    %177 = arith.addf %176, %175 : vector<1x128xf32>
    %178 = arith.divf %176, %177 : vector<1x128xf32>
    %179 = arith.mulf %172, %166 : vector<1x128xf32>
    %180 = arith.addf %163, %179 : vector<1x128xf32>
    %181 = math.tanh %180 : vector<1x128xf32>
    %cst_73 = arith.constant 1.000000e+00 : f32
    %182 = vector.broadcast %cst_73 : f32 to vector<1x128xf32>
    %183 = arith.subf %182, %178 : vector<1x128xf32>
    %184 = arith.mulf %183, %181 : vector<1x128xf32>
    %185 = arith.mulf %178, %154 : vector<1x128xf32>
    %186 = arith.addf %184, %185 : vector<1x128xf32>
    %c3_74 = arith.constant 3 : index
    %c0_75 = arith.constant 0 : index
    %187 = vector.load %arg15[%c3_74, %c0_75] : memref<8x128xf32, #tpu.memory_space<vmem>>, vector<1x128xf32>
    tpu.vector_store %arg15[%c3_74, %c0_75], %186 {strides = array<i32>} : memref<8x128xf32, #tpu.memory_space<vmem>>, vector<1x128xf32>,
    %c4_76 = arith.constant 4 : index
    %c0_77 = arith.constant 0 : index
    %188 = vector.load %arg14[%c4_76, %c0_77] : memref<8x384xf32, #tpu.memory_space<vmem>>, vector<1x384xf32>
    %c0_78 = arith.constant 0 : index
    %c0_79 = arith.constant 0 : index
    %189 = vector.load %arg5[%c0_78, %c0_79] : memref<128x384xf32, #tpu.memory_space<vmem>>, vector<128x384xf32>
    %cst_80 = arith.constant dense<0.000000e+00> : vector<1x384xf32>
    %190 = tpu.matmul %186, %189, %cst_80 {dimension_numbers = #tpu.dot_dimension_numbers<[1], [0], [0], [1], [0, 0, 1, 1], [], []>} : vector<1x128xf32>, vector<128x384xf32>, vector<1x384xf32> -> vector<1x384xf32>
    %c0_81 = arith.constant 0 : index
    %c0_82 = arith.constant 0 : index
    %191 = vector.load %arg7[%c0_81, %c0_82] : memref<1x384xf32, #tpu.memory_space<vmem>>, vector<1x384xf32>
    %192 = arith.addf %190, %191 : vector<1x384xf32>
    %193 = vector.extract_strided_slice %188 {offsets = [0, 0], sizes = [1, 128], strides = [1, 1]} : vector<1x384xf32> to vector<1x128xf32>
    %194 = vector.extract_strided_slice %188 {offsets = [0, 128], sizes = [1, 128], strides = [1, 1]} : vector<1x384xf32> to vector<1x128xf32>
    %195 = vector.extract_strided_slice %188 {offsets = [0, 256], sizes = [1, 128], strides = [1, 1]} : vector<1x384xf32> to vector<1x128xf32>
    %196 = vector.extract_strided_slice %192 {offsets = [0, 0], sizes = [1, 128], strides = [1, 1]} : vector<1x384xf32> to vector<1x128xf32>
    %197 = vector.extract_strided_slice %192 {offsets = [0, 128], sizes = [1, 128], strides = [1, 1]} : vector<1x384xf32> to vector<1x128xf32>
    %198 = vector.extract_strided_slice %192 {offsets = [0, 256], sizes = [1, 128], strides = [1, 1]} : vector<1x384xf32> to vector<1x128xf32>
    %199 = arith.addf %193, %196 : vector<1x128xf32>
    %200 = arith.negf %199 : vector<1x128xf32>
    %201 = math.exp %200 : vector<1x128xf32>
    %cst_83 = arith.constant 1.000000e+00 : f32
    %202 = vector.broadcast %cst_83 : f32 to vector<1x128xf32>
    %203 = arith.addf %202, %201 : vector<1x128xf32>
    %204 = arith.divf %202, %203 : vector<1x128xf32>
    %205 = arith.addf %194, %197 : vector<1x128xf32>
    %206 = arith.negf %205 : vector<1x128xf32>
    %207 = math.exp %206 : vector<1x128xf32>
    %cst_84 = arith.constant 1.000000e+00 : f32
    %208 = vector.broadcast %cst_84 : f32 to vector<1x128xf32>
    %209 = arith.addf %208, %207 : vector<1x128xf32>
    %210 = arith.divf %208, %209 : vector<1x128xf32>
    %211 = arith.mulf %204, %198 : vector<1x128xf32>
    %212 = arith.addf %195, %211 : vector<1x128xf32>
    %213 = math.tanh %212 : vector<1x128xf32>
    %cst_85 = arith.constant 1.000000e+00 : f32
    %214 = vector.broadcast %cst_85 : f32 to vector<1x128xf32>
    %215 = arith.subf %214, %210 : vector<1x128xf32>
    %216 = arith.mulf %215, %213 : vector<1x128xf32>
    %217 = arith.mulf %210, %186 : vector<1x128xf32>
    %218 = arith.addf %216, %217 : vector<1x128xf32>
    %c4_86 = arith.constant 4 : index
    %c0_87 = arith.constant 0 : index
    %219 = vector.load %arg15[%c4_86, %c0_87] : memref<8x128xf32, #tpu.memory_space<vmem>>, vector<1x128xf32>
    tpu.vector_store %arg15[%c4_86, %c0_87], %218 {strides = array<i32>} : memref<8x128xf32, #tpu.memory_space<vmem>>, vector<1x128xf32>,
    %c5_88 = arith.constant 5 : index
    %c0_89 = arith.constant 0 : index
    %220 = vector.load %arg14[%c5_88, %c0_89] : memref<8x384xf32, #tpu.memory_space<vmem>>, vector<1x384xf32>
    %c0_90 = arith.constant 0 : index
    %c0_91 = arith.constant 0 : index
    %221 = vector.load %arg5[%c0_90, %c0_91] : memref<128x384xf32, #tpu.memory_space<vmem>>, vector<128x384xf32>
    %cst_92 = arith.constant dense<0.000000e+00> : vector<1x384xf32>
    %222 = tpu.matmul %218, %221, %cst_92 {dimension_numbers = #tpu.dot_dimension_numbers<[1], [0], [0], [1], [0, 0, 1, 1], [], []>} : vector<1x128xf32>, vector<128x384xf32>, vector<1x384xf32> -> vector<1x384xf32>
    %c0_93 = arith.constant 0 : index
    %c0_94 = arith.constant 0 : index
    %223 = vector.load %arg7[%c0_93, %c0_94] : memref<1x384xf32, #tpu.memory_space<vmem>>, vector<1x384xf32>
    %224 = arith.addf %222, %223 : vector<1x384xf32>
    %225 = vector.extract_strided_slice %220 {offsets = [0, 0], sizes = [1, 128], strides = [1, 1]} : vector<1x384xf32> to vector<1x128xf32>
    %226 = vector.extract_strided_slice %220 {offsets = [0, 128], sizes = [1, 128], strides = [1, 1]} : vector<1x384xf32> to vector<1x128xf32>
    %227 = vector.extract_strided_slice %220 {offsets = [0, 256], sizes = [1, 128], strides = [1, 1]} : vector<1x384xf32> to vector<1x128xf32>
    %228 = vector.extract_strided_slice %224 {offsets = [0, 0], sizes = [1, 128], strides = [1, 1]} : vector<1x384xf32> to vector<1x128xf32>
    %229 = vector.extract_strided_slice %224 {offsets = [0, 128], sizes = [1, 128], strides = [1, 1]} : vector<1x384xf32> to vector<1x128xf32>
    %230 = vector.extract_strided_slice %224 {offsets = [0, 256], sizes = [1, 128], strides = [1, 1]} : vector<1x384xf32> to vector<1x128xf32>
    %231 = arith.addf %225, %228 : vector<1x128xf32>
    %232 = arith.negf %231 : vector<1x128xf32>
    %233 = math.exp %232 : vector<1x128xf32>
    %cst_95 = arith.constant 1.000000e+00 : f32
    %234 = vector.broadcast %cst_95 : f32 to vector<1x128xf32>
    %235 = arith.addf %234, %233 : vector<1x128xf32>
    %236 = arith.divf %234, %235 : vector<1x128xf32>
    %237 = arith.addf %226, %229 : vector<1x128xf32>
    %238 = arith.negf %237 : vector<1x128xf32>
    %239 = math.exp %238 : vector<1x128xf32>
    %cst_96 = arith.constant 1.000000e+00 : f32
    %240 = vector.broadcast %cst_96 : f32 to vector<1x128xf32>
    %241 = arith.addf %240, %239 : vector<1x128xf32>
    %242 = arith.divf %240, %241 : vector<1x128xf32>
    %243 = arith.mulf %236, %230 : vector<1x128xf32>
    %244 = arith.addf %227, %243 : vector<1x128xf32>
    %245 = math.tanh %244 : vector<1x128xf32>
    %cst_97 = arith.constant 1.000000e+00 : f32
    %246 = vector.broadcast %cst_97 : f32 to vector<1x128xf32>
    %247 = arith.subf %246, %242 : vector<1x128xf32>
    %248 = arith.mulf %247, %245 : vector<1x128xf32>
    %249 = arith.mulf %242, %218 : vector<1x128xf32>
    %250 = arith.addf %248, %249 : vector<1x128xf32>
    %c5_98 = arith.constant 5 : index
    %c0_99 = arith.constant 0 : index
    %251 = vector.load %arg15[%c5_98, %c0_99] : memref<8x128xf32, #tpu.memory_space<vmem>>, vector<1x128xf32>
    tpu.vector_store %arg15[%c5_98, %c0_99], %250 {strides = array<i32>} : memref<8x128xf32, #tpu.memory_space<vmem>>, vector<1x128xf32>,
    %c6_100 = arith.constant 6 : index
    %c0_101 = arith.constant 0 : index
    %252 = vector.load %arg14[%c6_100, %c0_101] : memref<8x384xf32, #tpu.memory_space<vmem>>, vector<1x384xf32>
    %c0_102 = arith.constant 0 : index
    %c0_103 = arith.constant 0 : index
    %253 = vector.load %arg5[%c0_102, %c0_103] : memref<128x384xf32, #tpu.memory_space<vmem>>, vector<128x384xf32>
    %cst_104 = arith.constant dense<0.000000e+00> : vector<1x384xf32>
    %254 = tpu.matmul %250, %253, %cst_104 {dimension_numbers = #tpu.dot_dimension_numbers<[1], [0], [0], [1], [0, 0, 1, 1], [], []>} : vector<1x128xf32>, vector<128x384xf32>, vector<1x384xf32> -> vector<1x384xf32>
    %c0_105 = arith.constant 0 : index
    %c0_106 = arith.constant 0 : index
    %255 = vector.load %arg7[%c0_105, %c0_106] : memref<1x384xf32, #tpu.memory_space<vmem>>, vector<1x384xf32>
    %256 = arith.addf %254, %255 : vector<1x384xf32>
    %257 = vector.extract_strided_slice %252 {offsets = [0, 0], sizes = [1, 128], strides = [1, 1]} : vector<1x384xf32> to vector<1x128xf32>
    %258 = vector.extract_strided_slice %252 {offsets = [0, 128], sizes = [1, 128], strides = [1, 1]} : vector<1x384xf32> to vector<1x128xf32>
    %259 = vector.extract_strided_slice %252 {offsets = [0, 256], sizes = [1, 128], strides = [1, 1]} : vector<1x384xf32> to vector<1x128xf32>
    %260 = vector.extract_strided_slice %256 {offsets = [0, 0], sizes = [1, 128], strides = [1, 1]} : vector<1x384xf32> to vector<1x128xf32>
    %261 = vector.extract_strided_slice %256 {offsets = [0, 128], sizes = [1, 128], strides = [1, 1]} : vector<1x384xf32> to vector<1x128xf32>
    %262 = vector.extract_strided_slice %256 {offsets = [0, 256], sizes = [1, 128], strides = [1, 1]} : vector<1x384xf32> to vector<1x128xf32>
    %263 = arith.addf %257, %260 : vector<1x128xf32>
    %264 = arith.negf %263 : vector<1x128xf32>
    %265 = math.exp %264 : vector<1x128xf32>
    %cst_107 = arith.constant 1.000000e+00 : f32
    %266 = vector.broadcast %cst_107 : f32 to vector<1x128xf32>
    %267 = arith.addf %266, %265 : vector<1x128xf32>
    %268 = arith.divf %266, %267 : vector<1x128xf32>
    %269 = arith.addf %258, %261 : vector<1x128xf32>
    %270 = arith.negf %269 : vector<1x128xf32>
    %271 = math.exp %270 : vector<1x128xf32>
    %cst_108 = arith.constant 1.000000e+00 : f32
    %272 = vector.broadcast %cst_108 : f32 to vector<1x128xf32>
    %273 = arith.addf %272, %271 : vector<1x128xf32>
    %274 = arith.divf %272, %273 : vector<1x128xf32>
    %275 = arith.mulf %268, %262 : vector<1x128xf32>
    %276 = arith.addf %259, %275 : vector<1x128xf32>
    %277 = math.tanh %276 : vector<1x128xf32>
    %cst_109 = arith.constant 1.000000e+00 : f32
    %278 = vector.broadcast %cst_109 : f32 to vector<1x128xf32>
    %279 = arith.subf %278, %274 : vector<1x128xf32>
    %280 = arith.mulf %279, %277 : vector<1x128xf32>
    %281 = arith.mulf %274, %250 : vector<1x128xf32>
    %282 = arith.addf %280, %281 : vector<1x128xf32>
    %c6_110 = arith.constant 6 : index
    %c0_111 = arith.constant 0 : index
    %283 = vector.load %arg15[%c6_110, %c0_111] : memref<8x128xf32, #tpu.memory_space<vmem>>, vector<1x128xf32>
    tpu.vector_store %arg15[%c6_110, %c0_111], %282 {strides = array<i32>} : memref<8x128xf32, #tpu.memory_space<vmem>>, vector<1x128xf32>,
    %c7_112 = arith.constant 7 : index
    %c0_113 = arith.constant 0 : index
    %284 = vector.load %arg14[%c7_112, %c0_113] : memref<8x384xf32, #tpu.memory_space<vmem>>, vector<1x384xf32>
    %c0_114 = arith.constant 0 : index
    %c0_115 = arith.constant 0 : index
    %285 = vector.load %arg5[%c0_114, %c0_115] : memref<128x384xf32, #tpu.memory_space<vmem>>, vector<128x384xf32>
    %cst_116 = arith.constant dense<0.000000e+00> : vector<1x384xf32>
    %286 = tpu.matmul %282, %285, %cst_116 {dimension_numbers = #tpu.dot_dimension_numbers<[1], [0], [0], [1], [0, 0, 1, 1], [], []>} : vector<1x128xf32>, vector<128x384xf32>, vector<1x384xf32> -> vector<1x384xf32>
    %c0_117 = arith.constant 0 : index
    %c0_118 = arith.constant 0 : index
    %287 = vector.load %arg7[%c0_117, %c0_118] : memref<1x384xf32, #tpu.memory_space<vmem>>, vector<1x384xf32>
    %288 = arith.addf %286, %287 : vector<1x384xf32>
    %289 = vector.extract_strided_slice %284 {offsets = [0, 0], sizes = [1, 128], strides = [1, 1]} : vector<1x384xf32> to vector<1x128xf32>
    %290 = vector.extract_strided_slice %284 {offsets = [0, 128], sizes = [1, 128], strides = [1, 1]} : vector<1x384xf32> to vector<1x128xf32>
    %291 = vector.extract_strided_slice %284 {offsets = [0, 256], sizes = [1, 128], strides = [1, 1]} : vector<1x384xf32> to vector<1x128xf32>
    %292 = vector.extract_strided_slice %288 {offsets = [0, 0], sizes = [1, 128], strides = [1, 1]} : vector<1x384xf32> to vector<1x128xf32>
    %293 = vector.extract_strided_slice %288 {offsets = [0, 128], sizes = [1, 128], strides = [1, 1]} : vector<1x384xf32> to vector<1x128xf32>
    %294 = vector.extract_strided_slice %288 {offsets = [0, 256], sizes = [1, 128], strides = [1, 1]} : vector<1x384xf32> to vector<1x128xf32>
    %295 = arith.addf %289, %292 : vector<1x128xf32>
    %296 = arith.negf %295 : vector<1x128xf32>
    %297 = math.exp %296 : vector<1x128xf32>
    %cst_119 = arith.constant 1.000000e+00 : f32
    %298 = vector.broadcast %cst_119 : f32 to vector<1x128xf32>
    %299 = arith.addf %298, %297 : vector<1x128xf32>
    %300 = arith.divf %298, %299 : vector<1x128xf32>
    %301 = arith.addf %290, %293 : vector<1x128xf32>
    %302 = arith.negf %301 : vector<1x128xf32>
    %303 = math.exp %302 : vector<1x128xf32>
    %cst_120 = arith.constant 1.000000e+00 : f32
    %304 = vector.broadcast %cst_120 : f32 to vector<1x128xf32>
    %305 = arith.addf %304, %303 : vector<1x128xf32>
    %306 = arith.divf %304, %305 : vector<1x128xf32>
    %307 = arith.mulf %300, %294 : vector<1x128xf32>
    %308 = arith.addf %291, %307 : vector<1x128xf32>
    %309 = math.tanh %308 : vector<1x128xf32>
    %cst_121 = arith.constant 1.000000e+00 : f32
    %310 = vector.broadcast %cst_121 : f32 to vector<1x128xf32>
    %311 = arith.subf %310, %306 : vector<1x128xf32>
    %312 = arith.mulf %311, %309 : vector<1x128xf32>
    %313 = arith.mulf %306, %282 : vector<1x128xf32>
    %314 = arith.addf %312, %313 : vector<1x128xf32>
    %c7_122 = arith.constant 7 : index
    %c0_123 = arith.constant 0 : index
    %315 = vector.load %arg15[%c7_122, %c0_123] : memref<8x128xf32, #tpu.memory_space<vmem>>, vector<1x128xf32>
    tpu.vector_store %arg15[%c7_122, %c0_123], %314 {strides = array<i32>} : memref<8x128xf32, #tpu.memory_space<vmem>>, vector<1x128xf32>,
    %c0_124 = arith.constant 0 : index
    %c0_125 = arith.constant 0 : index
    %316 = vector.load %arg12[%c0_124, %c0_125] : memref<1x128xf32, #tpu.memory_space<vmem>>, vector<1x128xf32>
    tpu.vector_store %arg12[%c0_124, %c0_125], %314 {strides = array<i32>} : memref<1x128xf32, #tpu.memory_space<vmem>>, vector<1x128xf32>,
    %c0_126 = arith.constant 0 : index
    %c0_127 = arith.constant 0 : index
    %317 = vector.load %arg11[%c0_126, %c0_127] : memref<1x128xf32, #tpu.memory_space<vmem>>, vector<1x128xf32>
    tpu.vector_store %arg11[%c0_126, %c0_127], %314 {strides = array<i32>} : memref<1x128xf32, #tpu.memory_space<vmem>>, vector<1x128xf32>,
    %c0_128 = arith.constant 0 : index
    %c0_129 = arith.constant 0 : index
    %318 = vector.load %arg15[%c0_128, %c0_129] : memref<8x128xf32, #tpu.memory_space<vmem>>, vector<8x128xf32>
    %c0_130 = arith.constant 0 : index
    %c0_131 = arith.constant 0 : index
    %319 = vector.load %arg8[%c0_130, %c0_131] : memref<128x128xf32, #tpu.memory_space<vmem>>, vector<128x128xf32>
    %cst_132 = arith.constant dense<0.000000e+00> : vector<8x128xf32>
    %320 = tpu.matmul %318, %319, %cst_132 {dimension_numbers = #tpu.dot_dimension_numbers<[1], [0], [0], [1], [0, 0, 1, 1], [], []>} : vector<8x128xf32>, vector<128x128xf32>, vector<8x128xf32> -> vector<8x128xf32>
    %c0_133 = arith.constant 0 : index
    %c0_134 = arith.constant 0 : index
    %321 = vector.load %arg9[%c0_133, %c0_134] : memref<1x128xf32, #tpu.memory_space<vmem>>, vector<1x128xf32>
    %322 = vector.broadcast %321 : vector<1x128xf32> to vector<8x128xf32>
    %323 = arith.addf %320, %322 : vector<8x128xf32>
    %324 = tpu.iota {dimensions = array<i32: 1>} : vector<8x128xi32>
    %c64_i32 = arith.constant 64 : i32
    %325 = vector.broadcast %c64_i32 : i32 to vector<8x128xi32>
    %326 = arith.cmpi slt, %324, %325 : vector<8x128xi32>
    %cst_135 = arith.constant -1.000000e+30 : f32
    %327 = vector.broadcast %cst_135 : f32 to vector<8x128xf32>
    %328 = arith.select %326, %323, %327 : vector<8x128xi1>, vector<8x128xf32>
    %cst_136 = arith.constant dense<0xFF800000> : vector<8xf32>
    %329 = vector.multi_reduction <maximumf>, %328, %cst_136 [1] : vector<8x128xf32> to vector<8xf32>
    %330 = vector.shape_cast %329 : vector<8xf32> to vector<8x1xf32>
    %331 = vector.broadcast %330 : vector<8x1xf32> to vector<8x128xf32>
    %332 = arith.subf %328, %331 : vector<8x128xf32>
    %333 = math.exp %332 : vector<8x128xf32>
    %cst_137 = arith.constant dense<0.000000e+00> : vector<8xf32>
    %334 = vector.multi_reduction <add>, %333, %cst_137 [1] : vector<8x128xf32> to vector<8xf32>
    %335 = vector.shape_cast %334 : vector<8xf32> to vector<8x1xf32>
    %336 = math.log %335 : vector<8x1xf32>
    %337 = vector.broadcast %336 : vector<8x1xf32> to vector<8x128xf32>
    %338 = arith.subf %332, %337 : vector<8x128xf32>
    %c0_138 = arith.constant 0 : index
    %c0_139 = arith.constant 0 : index
    %339 = vector.load %arg10[%c0_138, %c0_139] : memref<8x128xf32, #tpu.memory_space<vmem>>, vector<8x128xf32>
    tpu.vector_store %arg10[%c0_138, %c0_139], %338 {strides = array<i32>} : memref<8x128xf32, #tpu.memory_space<vmem>>, vector<8x128xf32>,
    return
  }
  func.func @transform_0(%arg0: i32, %arg1: memref<8xi32, #tpu.memory_space<smem>>) -> (i32, i32) {
    %c0_i32 = arith.constant 0 : i32
    %c0_i32_0 = arith.constant 0 : i32
    %c0_i32_1 = arith.constant 0 : i32
    return %c0_i32, %c0_i32_0 : i32, i32
  }
  func.func @transform_1(%arg0: i32, %arg1: memref<8xi32, #tpu.memory_space<smem>>) -> (i32, i32) {
    %c0_i32 = arith.constant 0 : i32
    %c0_i32_0 = arith.constant 0 : i32
    %c0_i32_1 = arith.constant 0 : i32
    return %c0_i32, %c0_i32_0 : i32, i32
  }
  func.func @transform_2(%arg0: i32, %arg1: memref<8xi32, #tpu.memory_space<smem>>) -> (i32, i32) {
    %c0_i32 = arith.constant 0 : i32
    %c0_i32_0 = arith.constant 0 : i32
    %c0_i32_1 = arith.constant 0 : i32
    return %c0_i32, %c0_i32_0 : i32, i32
  }
  func.func @transform_3(%arg0: i32, %arg1: memref<8xi32, #tpu.memory_space<smem>>) -> (i32, i32) {
    %c0_i32 = arith.constant 0 : i32
    %c0_i32_0 = arith.constant 0 : i32
    %c0_i32_1 = arith.constant 0 : i32
    return %c0_i32, %c0_i32_0 : i32, i32
  }
  func.func @transform_4(%arg0: i32, %arg1: memref<8xi32, #tpu.memory_space<smem>>) -> (i32, i32) {
    %c0_i32 = arith.constant 0 : i32
    %c0_i32_0 = arith.constant 0 : i32
    %c0_i32_1 = arith.constant 0 : i32
    return %c0_i32, %c0_i32_0 : i32, i32
  }
  func.func @transform_5(%arg0: i32, %arg1: memref<8xi32, #tpu.memory_space<smem>>) -> (i32, i32) {
    %c0_i32 = arith.constant 0 : i32
    %c0_i32_0 = arith.constant 0 : i32
    %c0_i32_1 = arith.constant 0 : i32
    return %c0_i32, %c0_i32_0 : i32, i32
  }
  func.func @transform_6(%arg0: i32, %arg1: memref<8xi32, #tpu.memory_space<smem>>) -> (i32, i32) {
    %c0_i32 = arith.constant 0 : i32
    %c0_i32_0 = arith.constant 0 : i32
    %c0_i32_1 = arith.constant 0 : i32
    return %c0_i32, %c0_i32_0 : i32, i32
  }
  func.func @transform_7(%arg0: i32, %arg1: memref<8xi32, #tpu.memory_space<smem>>) -> (i32, i32) {
    %c0_i32 = arith.constant 0 : i32
    %c0_i32_0 = arith.constant 0 : i32
    %c0_i32_1 = arith.constant 0 : i32
    return %c0_i32, %c0_i32_0 : i32, i32
  }
  func.func @transform_8(%arg0: i32, %arg1: memref<8xi32, #tpu.memory_space<smem>>) -> (i32, i32) {
    %c0_i32 = arith.constant 0 : i32
    %c0_i32_0 = arith.constant 0 : i32
    return %arg0, %c0_i32 : i32, i32
  }
  func.func @transform_9(%arg0: i32, %arg1: memref<8xi32, #tpu.memory_space<smem>>) -> (i32, i32) {
    %c0_i32 = arith.constant 0 : i32
    %c0_i32_0 = arith.constant 0 : i32
    %c0_i32_1 = arith.constant 0 : i32
    return %c0_i32, %c0_i32_0 : i32, i32
  }
}

</mosaic_0001>

<bundles_post_ra>
// kernel: decoder_rnn_decode.1
= control target key start
LH: loop header
LB: loop body
LE: loop exit
PB: predicated region body
PF: predicated region fallthrough
CT: control target
= control target key end

     0   :  { %s1987_s16 = smov [#allocation7]   ;;  %s2792_s0 = inlined_call_operand.hbm [shape: s32[8], index: 0, kind: input, shape index: {}]   ;;  %s2793_s1 = inlined_call_operand.vmem [shape: f32[1,128], index: 1, kind: input, shape index: {}]   ;;  %s2794_s2 = inlined_call_operand.hbm [shape: f32[64,128], index: 2, kind: input, shape index: {}]   ;;  %s2795_s3 = inlined_call_operand.hbm [shape: f32[128,384], index: 3, kind: input, shape index: {}]   ;;  %s2796_s4 = inlined_call_operand.hbm [shape: f32[128,384], index: 4, kind: input, shape index: {}]   ;;  %s2797_s5 = inlined_call_operand.vmem [shape: f32[1,384], index: 5, kind: input, shape index: {}]   ;;  %s2798_s6 = inlined_call_operand.vmem [shape: f32[1,384], index: 6, kind: input, shape index: {}]   ;;  %s2799_s7 = inlined_call_operand.hbm [shape: f32[128,128], index: 7, kind: input, shape index: {}]   ;;  %s2800_s8 = inlined_call_operand.vmem [shape: f32[1,128], index: 8, kind: input, shape index: {}]   ;;  %s2801_s9 = inlined_call_operand.hbm [shape: f32[8,128], index: 9, kind: output, shape index: {0}]   ;;  %s2802_s10 = inlined_call_operand.vmem [shape: f32[1,128], index: 10, kind: output, shape index: {1}]  }
   0x1   :  { %s17_s15 = sshll.u32 %s2792_s0, 4  ;;  %s18_s15 = int_to_ptr.hbm [resolvable:$true] %s17_s15 }
   0x2   :  { %20 = dma.hbm_to_smem %s18_s15, 16, %s1987_s16, [#allocation6] }
   0x3   :  { %1977 = dma.done.wait [#allocation6], 16 }
   0x4   :  { %1978 = vsyncadd [#allocation6], 4294967280 }
   0x5   :  { %23 = sfence }
   0x6   :  { %24 = vsyncpa [#allocation9], 0 }
   0x7   :  { %25 = vsyncpa [#allocation12], 0 }
   0x8   :  { %26 = vsyncpa [#allocation15], 0  ;;  %s47_s19 = sshll.u32 %s2795_s3, 4  ;;  %s48_s19 = int_to_ptr.hbm [resolvable:$true] %s47_s19 }
   0x9   :  { %27 = vsyncpa [#allocation10], 0  ;;  %s1988_s20 = smov [#allocation11]   ;;  %s34_s23 = sshll.u32 %s2794_s2, 4  ;;  %s35_s23 = int_to_ptr.hbm [resolvable:$true] %s34_s23 }
   0xa   :  { %s49_s21 = sshll.u32 %s1988_s20, 4  ;;  %s1989_s24 = smov 384   ;;  %s50_s21 = int_to_ptr.vmem [resolvable:$true] %s49_s21 }
   0xb   :  { %s1990_s25 = smov 24   ;;  %s1991_s26 = smov [#allocation8]  }
   0xc   :  { %55 = dma.hbm_to_vmem [thread:$0]  %s48_s19, 6144, %s50_s21, [#allocation12], %s1989_s24, %s1989_s24, %s1990_s25  }
   0xd   :  { %s36_s27 = sshll.u32 %s1991_s26, 4  ;;  %s1992_s28 = smov 128   ;;  %s37_s27 = int_to_ptr.vmem [resolvable:$true] %s36_s27 }
   0xe   :  { %s1993_s29 = smov 8   ;;  %s60_s11 = sshll.u32 %s2796_s4, 4  ;;  %s61_s11 = int_to_ptr.hbm [resolvable:$true] %s60_s11 }
   0xf   :  { %42 = dma.hbm_to_vmem [thread:$0]  %s35_s23, 1024, %s37_s27, [#allocation9], %s1992_s28, %s1992_s28, %s1993_s29  }
  0x10   :  { %s1994_s12 = smov [#allocation13]   ;;  %s77_s15 = sshll.u32 %s2799_s7, 4  ;;  %s78_s15 = int_to_ptr.hbm [resolvable:$true] %s77_s15 }
  0x11   :  { %s62_s13 = sshll.u32 %s1994_s12, 4  ;;  %s1995_s16 = smov [#allocation14]   ;;  %s63_s13 = int_to_ptr.vmem [resolvable:$true] %s62_s13 }
  0x12   :  { %68 = dma.hbm_to_vmem [thread:$0]  %s61_s11, 6144, %s63_s13, [#allocation12], %s1989_s24, %s1989_s24, %s1990_s25  }
  0x13   :  { %s79_s17 = sshll.u32 %s1995_s16, 4  ;;  %s80_s17 = int_to_ptr.vmem [resolvable:$true] %s79_s17 }
  0x14   :  { %85 = dma.hbm_to_vmem [thread:$0]  %s78_s15, 2048, %s80_s17, [#allocation15], %s1992_s28, %s1992_s28, %s1993_s29  }
  0x15   :  { %1979 = dma.done.wait [#allocation9], 1024  }
  0x16   :  { %1980 = vsyncadd [#allocation9], 4294966272 }
  0x17   :  { %1981 = dma.done.wait [#allocation12], 12288  }
  0x18   :  { %1982 = vsyncadd [#allocation12], 4294955008 }
  0x19   :  { %1983 = dma.done.wait [#allocation15], 2048  }
  0x1a   :  { %1984 = vsyncadd [#allocation15], 4294965248  ;;  %v196_v0 = vld [vmem:[#allocation11 + $0x168] sm:$0xff]  ;;  %v198_v1 = vld [vmem:[#allocation11 + $0x178] sm:$0xff]  ;;  %s2067_s4 = sld [smem:[#allocation7]] }
  0x1b   :  { %v193_v2 = vld [vmem:[#allocation11 + $0x150] sm:$0xff]  ;;  %207 = vmatpush.msra.mxu0 %v196_v0  ;;  %247 = vmatpush.msra.mxu2 %v198_v1  ;;  %v195_v3 = vld [vmem:[#allocation11 + $0x160] sm:$0xff]  ;;  %v190_v4 = vld [vmem:[#allocation11 + $0x138] sm:$0xff]  ;;  %s2071_s7 = sld [smem:[#allocation7 + $0x1]] }
  0x1c   :  { %v192_v5 = vld [vmem:[#allocation11 + $0x148] sm:$0xff]  ;;  %v197_v6 = vld [vmem:[#allocation11 + $0x170] sm:$0xff]  ;;  %v194_v7 = vld [vmem:[#allocation11 + $0x158] sm:$0xff]  ;;  %s2075_s18 = sld [smem:[#allocation7 + $0x2]] }
  0x1d   :  { %208 = vmatpush.msra.mxu0 %v193_v2  ;;  %248 = vmatpush.msra.mxu2 %v195_v3  ;;  %v187_v8 = vld [vmem:[#allocation11 + $0x120] sm:$0xff]  ;;  %v189_v9 = vld [vmem:[#allocation11 + $0x130] sm:$0xff]  ;;  %v2069_v10 = vld [vmem:[#allocation13 + $0x168] sm:$0xff]  ;;  %s2078_s19 = sld [smem:[#allocation7 + $0x3]] }
  0x1e   :  { %227 = vmatpush.msra.mxu1 %v197_v6  ;;  %v191_v11 = vld [vmem:[#allocation11 + $0x140] sm:$0xff]  ;;  %v2073_v12 = vld [vmem:[#allocation13 + $0x150] sm:$0xff]  ;;  %v184_v13 = vld [vmem:[#allocation11 + $0x108] sm:$0xff]  ;;  %328 = vmatpush.msra.mxu3 %v2069_v10  ;;  %s2082_s20 = sld [smem:[#allocation7 + $0x4]] }
  0x1f   :  { %209 = vmatpush.msra.mxu0 %v190_v4  ;;  %249 = vmatpush.msra.mxu2 %v192_v5  ;;  %v186_v14 = vld [vmem:[#allocation11 + $0x118] sm:$0xff]  ;;  %v188_v15 = vld [vmem:[#allocation11 + $0x128] sm:$0xff]  ;;  %v181_v17 = vld [vmem:[#allocation11 + $0xf0] sm:$0xff]  ;;  %s2085_s21 = sld [smem:[#allocation7 + $0x5]] }
  0x20   :  { %228 = vmatpush.msra.mxu1 %v194_v7  ;;  %v2080_v16 = vld [vmem:[#allocation13 + $0x138] sm:$0xff]  ;;  %v183_v18 = vld [vmem:[#allocation11 + $0x100] sm:$0xff]  ;;  %329 = vmatpush.msra.mxu3 %v2073_v12  ;;  %v185_v19 = vld [vmem:[#allocation11 + $0x110] sm:$0xff]  ;;  %s2089_s22 = sld [smem:[#allocation7 + $0x6]]  ;;  %s112_s23 = scalar_lea.vmem [#allocation8], %s2067_s4 }
  0x21   :  { %210 = vmatpush.msra.mxu0 %v187_v8  ;;  %250 = vmatpush.msra.mxu2 %v189_v9  ;;  %v2087_v20 = vld [vmem:[#allocation13 + $0x120] sm:$0xff]  ;;  %v178_v21 = vld [vmem:[#allocation11 + $0xd8] sm:$0xff]  ;;  %v180_v22 = vld [vmem:[#allocation11 + $0xe8] sm:$0xff]  ;;  %s2092_s0 = sld [smem:[#allocation7 + $0x7]]  ;;  %s117_s24 = scalar_lea.vmem [#allocation8], %s2071_s7 }
  0x22   :  { %229 = vmatpush.msra.mxu1 %v191_v11  ;;  %330 = vmatpush.msra.mxu3 %v2080_v16  ;;  %v182_v23 = vld [vmem:[#allocation11 + $0xf8] sm:$0xff]  ;;  %v2094_v24 = vld [vmem:[#allocation13 + $0x108] sm:$0xff]  ;;  %v175_v25 = vld [vmem:[#allocation11 + $0xc0] sm:$0xff]  ;;  %s122_s25 = scalar_lea.vmem [#allocation8], %s2075_s18 }
  0x23   :  { %211 = vmatpush.msra.mxu0 %v184_v13  ;;  %251 = vmatpush.msra.mxu2 %v186_v14  ;;  %v177_v26 = vld [vmem:[#allocation11 + $0xd0] sm:$0xff]  ;;  %v179_v27 = vld [vmem:[#allocation11 + $0xe0] sm:$0xff]  ;;  %v172_v29 = vld [vmem:[#allocation11 + $0xa8] sm:$0xff]  ;;  %s127_s26 = scalar_lea.vmem [#allocation8], %s2078_s19 }
  0x24   :  { %230 = vmatpush.msra.mxu1 %v188_v15  ;;  %331 = vmatpush.msra.mxu3 %v2087_v20  ;;  %v2097_v28 = vld [vmem:[#allocation13 + $0xf0] sm:$0xff]  ;;  %v174_v30 = vld [vmem:[#allocation11 + $0xb8] sm:$0xff]  ;;  %v176_v31 = vld [vmem:[#allocation11 + $0xc8] sm:$0xff]  ;;  %s132_s27 = scalar_lea.vmem [#allocation8], %s2082_s20 }
  0x25   :  { %212 = vmatpush.msra.mxu0 %v181_v17  ;;  %252 = vmatpush.msra.mxu2 %v183_v18  ;;  %v2100_v32 = vld [vmem:[#allocation13 + $0xd8] sm:$0xff]  ;;  %v169_v33 = vld [vmem:[#allocation11 + $0x90] sm:$0xff]  ;;  %v171_v34 = vld [vmem:[#allocation11 + $0xa0] sm:$0xff]  ;;  %s137_s28 = scalar_lea.vmem [#allocation8], %s2085_s21 }
  0x26   :  { %231 = vmatpush.msra.mxu1 %v185_v19  ;;  %332 = vmatpush.msra.mxu3 %v2094_v24  ;;  %v166_v35 = vld [vmem:[#allocation11 + $0x78] sm:$0xff]  ;;  %v173_v36 = vld [vmem:[#allocation11 + $0xb0] sm:$0xff]  ;;  %v2103_v37 = vld [vmem:[#allocation13 + $0xc0] sm:$0xff]  ;;  %s142_s29 = scalar_lea.vmem [#allocation8], %s2089_s22 }
  0x27   :  { %213 = vmatpush.msra.mxu0 %v178_v21  ;;  %253 = vmatpush.msra.mxu2 %v180_v22  ;;  %v168_v38 = vld [vmem:[#allocation11 + $0x88] sm:$0xff]  ;;  %v170_v39 = vld [vmem:[#allocation11 + $0x98] sm:$0xff]  ;;  %v113_v41 = vld [vmem:[%s112_s23] sm:$0x1]  ;;  %s147_s3 = scalar_lea.vmem [#allocation8], %s2092_s0 }
  0x28   :  { %232 = vmatpush.msra.mxu1 %v182_v23  ;;  %333 = vmatpush.msra.mxu3 %v2097_v28  ;;  %v2106_v40 = vld [vmem:[#allocation13 + $0xa8] sm:$0xff]  ;;  %v118_v42 = vld [vmem:[%s117_s24] sm:$0x1]  ;;  %v163_v44 = vld [vmem:[#allocation11 + $0x60] sm:$0xff]  ;;  %114 = vst [vmem:[#allocation3] sm:$0x1] %v113_v41 }
  0x29   :  { %214 = vmatpush.msra.mxu0 %v175_v25  ;;  %254 = vmatpush.msra.mxu2 %v177_v26  ;;  %v123_v43 = vld [vmem:[%s122_s25] sm:$0x1]  ;;  %v167_v47 = vld [vmem:[#allocation11 + $0x80] sm:$0xff]  ;;  %119 = vst [vmem:[#allocation3 + $0x1] sm:$0x1] %v118_v42  ;;  %v160_v50 = vld [vmem:[#allocation11 + $0x48] sm:$0xff] }
  0x2a   :  { %233 = vmatpush.msra.mxu1 %v179_v27  ;;  %334 = vmatpush.msra.mxu3 %v2100_v32  ;;  %v165_v45 = vld [vmem:[#allocation11 + $0x70] sm:$0xff]  ;;  %v162_v51 = vld [vmem:[#allocation11 + $0x58] sm:$0xff]  ;;  %124 = vst [vmem:[#allocation3 + $0x2] sm:$0x1] %v123_v43  ;;  %v164_v53 = vld [vmem:[#allocation11 + $0x68] sm:$0xff] }
  0x2b   :  { %215 = vmatpush.msra.mxu0 %v172_v29  ;;  %255 = vmatpush.msra.mxu2 %v174_v30  ;;  %v128_v46 = vld [vmem:[%s127_s26] sm:$0x1]  ;;  %v2118_v54 = vld [vmem:[#allocation13 + $0x78] sm:$0xff]  ;;  %v159_v57 = vld [vmem:[#allocation11 + $0x40] sm:$0xff] }
  0x2c   :  { %234 = vmatpush.msra.mxu1 %v176_v31  ;;  %335 = vmatpush.msra.mxu3 %v2103_v37  ;;  %v2113_v48 = vld [vmem:[#allocation13 + $0x90] sm:$0xff]  ;;  %129 = vst [vmem:[#allocation3 + $0x3] sm:$0x1] %v128_v46  ;;  %v2123_v60 = vld [vmem:[#allocation13 + $0x60] sm:$0xff]  ;;  %v154_v61 = vld [vmem:[#allocation11 + $0x18] sm:$0xff] }
  0x2d   :  { %216 = vmatpush.msra.mxu0 %v169_v33  ;;  %256 = vmatpush.msra.mxu2 %v171_v34  ;;  %v133_v49 = vld [vmem:[%s132_s27] sm:$0x1]  ;;  %v156_v62 = vld [vmem:[#allocation11 + $0x28] sm:$0xff]  ;;  %v158_v0 = vld [vmem:[#allocation11 + $0x38] sm:$0xff] }
  0x2e   :  { %235 = vmatpush.msra.mxu1 %v173_v36  ;;  %336 = vmatpush.msra.mxu3 %v2106_v40  ;;  %v138_v52 = vld [vmem:[%s137_s28] sm:$0x1]  ;;  %134 = vst [vmem:[#allocation3 + $0x4] sm:$0x1] %v133_v49  ;;  %v2129_v1 = vld [vmem:[#allocation13 + $0x48] sm:$0xff]  ;;  %v151_v2 = vld [vmem:[#allocation11] sm:$0xff] }
  0x2f   :  { %217 = vmatpush.msra.mxu0 %v166_v35  ;;  %257 = vmatpush.msra.mxu2 %v168_v38  ;;  %v143_v55 = vld [vmem:[%s142_s29] sm:$0x1]  ;;  %139 = vst [vmem:[#allocation3 + $0x5] sm:$0x1] %v138_v52  ;;  %v155_v5 = vld [vmem:[#allocation11 + $0x20] sm:$0xff]  ;;  %v2137_v7 = vld [vmem:[#allocation13 + $0x158] sm:$0xff] }
  0x30   :  { %236 = vmatpush.msra.mxu1 %v170_v39  ;;  %v157_v56 = vld [vmem:[#allocation11 + $0x30] sm:$0xff]  ;;  %337 = vmatpush.msra.mxu3 %v2113_v48  ;;  %144 = vst [vmem:[#allocation3 + $0x6] sm:$0x1] %v143_v55  ;;  %v152_v8 = vld [vmem:[#allocation11 + $0x8] sm:$0xff]  ;;  %v2140_v9 = vld [vmem:[#allocation13 + $0x18] sm:$0xff] }
  0x31   :  { %218 = vmatpush.msra.mxu0 %v163_v44  ;;  %258 = vmatpush.msra.mxu2 %v165_v45  ;;  %v148_v58 = vld [vmem:[%s147_s3] sm:$0x1]  ;;  %v2143_v11 = vld [vmem:[#allocation13 + $0x140] sm:$0xff]  ;;  %v2150_v15 = vld [vmem:[#allocation13 + $0x128] sm:$0xff] }
  0x32   :  { %237 = vmatpush.msra.mxu1 %v167_v47  ;;  %v161_v59 = vld [vmem:[#allocation11 + $0x50] sm:$0xff]  ;;  %338 = vmatpush.msra.mxu3 %v2118_v54  ;;  %149 = vst [vmem:[#allocation3 + $0x7] sm:$0x1] %v148_v58  ;;  %v2147_v14 = vld [vmem:[#allocation13] sm:$0xff]  ;;  %v2155_v18 = vld [vmem:[#allocation13 + $0x178] sm:$0xff] }
  0x33   :  { %219 = vmatpush.msra.mxu0 %v160_v50  ;;  %259 = vmatpush.msra.mxu2 %v162_v51  ;;  %v109_v63 = vld [vmem:[%s2793_s1] sm:$0x1]  ;;  %v2162_v21 = vld [vmem:[#allocation13 + $0x160] sm:$0xff]  ;;  %v2164_v22 = vld [vmem:[#allocation13 + $0xf8] sm:$0xff] }
  0x34   :  { %238 = vmatpush.msra.mxu1 %v164_v53  ;;  %v153_v3 = vld [vmem:[#allocation11 + $0x10] sm:$0xff]  ;;  %339 = vmatpush.msra.mxu3 %v2123_v60  ;;  %110 = vst [vmem:[#allocation2] sm:$0x1] %v109_v63  ;;  %v2169_v23 = vld [vmem:[#allocation13 + $0x148] sm:$0xff]  ;;  %v2172_v25 = vld [vmem:[#allocation13 + $0xe0] sm:$0xff] }
  0x35   :  { %220 = vmatpush.msra.mxu0 %v157_v56  ;;  %260 = vmatpush.msra.mxu2 %v159_v57  ;;  %v2132_v4 = vld [vmem:[#allocation13 + $0x170] sm:$0xff]  ;;  %v2180_v27 = vld [vmem:[#allocation13 + $0xc8] sm:$0xff]  ;;  %v2185_v29 = vld [vmem:[#allocation13 + $0x118] sm:$0xff] }
  0x36   :  { %239 = vmatpush.msra.mxu1 %v161_v59  ;;  %340 = vmatpush.msra.mxu3 %v2129_v1  ;;  %v2135_v6 = vld [vmem:[#allocation13 + $0x30] sm:$0xff]  ;;  %v2193_v31 = vld [vmem:[#allocation13 + $0x100] sm:$0xff]  ;;  %v2196_v33 = vld [vmem:[#allocation13 + $0x98] sm:$0xff] }
  0x37   :  { %221 = vmatpush.msra.mxu0 %v154_v61  ;;  %261 = vmatpush.msra.mxu2 %v156_v62  ;;  %v2158_v19 = vld [vmem:[#allocation13 + $0x110] sm:$0xff]  ;;  %v2201_v34 = vld [vmem:[#allocation13 + $0xe8] sm:$0xff]  ;;  %v2204_v35 = vld [vmem:[#allocation13 + $0x80] sm:$0xff] }
  0x38   :  { %240 = vmatpush.msra.mxu1 %v158_v0  ;;  %341 = vmatpush.msra.mxu3 %v2135_v6  ;;  %v2177_v26 = vld [vmem:[#allocation13 + $0x130] sm:$0xff]  ;;  %v2212_v38 = vld [vmem:[#allocation13 + $0x68] sm:$0xff]  ;;  %v2217_v39 = vld [vmem:[#allocation13 + $0xb8] sm:$0xff] }
  0x39   :  { %222 = vmatpush.msra.mxu0 %v151_v2  ;;  %262 = vmatpush.msra.mxu2 %v153_v3  ;;  %v150_v13 = vld [vmem:[#allocation3] sm:$0xff]  ;;  %v2188_v30 = vld [vmem:[#allocation13 + $0xb0] sm:$0xff]  ;;  %v2225_v42 = vld [vmem:[#allocation13 + $0xa0] sm:$0xff] }
  0x3a   :  { %241 = vmatpush.msra.mxu1 %v155_v5  ;;  %263 = vmatmul.f32.vlgmr.msra.gmra.mxu2 %v150_v13  ;;  %v2209_v36 = vld [vmem:[#allocation13 + $0xd0] sm:$0xff]  ;;  %v2228_v43 = vld [vmem:[#allocation13 + $0x38] sm:$0xff]  ;;  %v2233_v44 = vld [vmem:[#allocation13 + $0x88] sm:$0xff] }
  0x3b   :  { %348 = vmatpush.msrb.mxu0 %v2132_v4  ;;  %499 = vmatpush.msrb.mxu2 %v2069_v10  ;;  %v2152_v17 = vld [vmem:[#allocation2] sm:$0x1]  ;;  %v2236_v45 = vld [vmem:[#allocation13 + $0x20] sm:$0xff]  ;;  %v2244_v47 = vld [vmem:[#allocation13 + $0x8] sm:$0xff] }
  0x3c   :  { %242 = vmatpush.msra.mxu1 %v152_v8  ;;  %342 = vmatpush.msra.mxu3 %v2140_v9  ;;  %v2220_v41 = vld [vmem:[#allocation13 + $0x50] sm:$0xff]  ;;  %v2249_v49 = vld [vmem:[#allocation13 + $0x58] sm:$0xff]  ;;  %v2255_v50 = vld [vmem:[#allocation13 + $0x40] sm:$0xff] }
  0x3d   :  { %349 = vmatpush.msrb.mxu0 %v2137_v7  ;;  %243 = vmatmul.f32.vlgmr.msra.gmra.mxu1 %v150_v13  ;;  %v2241_v46 = vld [vmem:[#allocation13 + $0x70] sm:$0xff]  ;;  %v2260_v51 = vld [vmem:[#allocation13 + $0x28] sm:$0xff] }
  0x3e   :  { %223 = vmatmul.f32.vlgmr.msra.gmra.mxu0 %v150_v13  ;;  %343 = vmatpush.msra.mxu3 %v2147_v14  ;;  %v2266_v52 = vld [vmem:[#allocation13 + $0x10] sm:$0xff] }
  0x3f   :  { %350 = vmatpush.msrb.mxu0 %v2143_v11  ;;  %344 = vmatmul.f32.vlgmr.msra.gmra.mxu3 %v2152_v17 }
  0x40   :  { %368 = vmatpush.msrb.mxu1 %v2155_v18  ;;  %519 = vmatpush.msrb.mxu3 %v2132_v4 }
  0x41   :  { %351 = vmatpush.msrb.mxu0 %v2150_v15  ;;  %500 = vmatpush.msrb.mxu2 %v2073_v12 }
  0x42   :  { %369 = vmatpush.msrb.mxu1 %v2162_v21  ;;  %520 = vmatpush.msrb.mxu3 %v2137_v7 }
  0x43   :  { %352 = vmatpush.msrb.mxu0 %v2158_v19  ;;  %501 = vmatpush.msrb.mxu2 %v2080_v16 }
  0x44   :  { %370 = vmatpush.msrb.mxu1 %v2169_v23  ;;  %521 = vmatpush.msrb.mxu3 %v2143_v11 }
  0x45   :  { %353 = vmatpush.msrb.mxu0 %v2164_v22  ;;  %502 = vmatpush.msrb.mxu2 %v2087_v20 }
  0x46   :  { %371 = vmatpush.msrb.mxu1 %v2177_v26  ;;  %522 = vmatpush.msrb.mxu3 %v2150_v15 }
  0x47   :  { %354 = vmatpush.msrb.mxu0 %v2172_v25  ;;  %503 = vmatpush.msrb.mxu2 %v2094_v24 }
  0x48   :  { %372 = vmatpush.msrb.mxu1 %v2185_v29  ;;  %523 = vmatpush.msrb.mxu3 %v2158_v19 }
  0x49   :  { %355 = vmatpush.msrb.mxu0 %v2180_v27  ;;  %504 = vmatpush.msrb.mxu2 %v2097_v28 }
  0x4a   :  { %373 = vmatpush.msrb.mxu1 %v2193_v31  ;;  %524 = vmatpush.msrb.mxu3 %v2164_v22 }
  0x4b   :  { %356 = vmatpush.msrb.mxu0 %v2188_v30  ;;  %505 = vmatpush.msrb.mxu2 %v2100_v32 }
  0x4c   :  { %374 = vmatpush.msrb.mxu1 %v2201_v34  ;;  %525 = vmatpush.msrb.mxu3 %v2172_v25 }
  0x4d   :  { %357 = vmatpush.msrb.mxu0 %v2196_v33  ;;  %506 = vmatpush.msrb.mxu2 %v2103_v37 }
  0x4e   :  { %375 = vmatpush.msrb.mxu1 %v2209_v36  ;;  %526 = vmatpush.msrb.mxu3 %v2180_v27 }
  0x4f   :  { %358 = vmatpush.msrb.mxu0 %v2204_v35  ;;  %507 = vmatpush.msrb.mxu2 %v2106_v40 }
  0x50   :  { %376 = vmatpush.msrb.mxu1 %v2217_v39  ;;  %527 = vmatpush.msrb.mxu3 %v2188_v30 }
  0x51   :  { %359 = vmatpush.msrb.mxu0 %v2212_v38  ;;  %508 = vmatpush.msrb.mxu2 %v2113_v48 }
  0x52   :  { %377 = vmatpush.msrb.mxu1 %v2225_v42  ;;  %528 = vmatpush.msrb.mxu3 %v2196_v33 }
  0x53   :  { %360 = vmatpush.msrb.mxu0 %v2220_v41  ;;  %509 = vmatpush.msrb.mxu2 %v2118_v54 }
  0x54   :  { %378 = vmatpush.msrb.mxu1 %v2233_v44  ;;  %529 = vmatpush.msrb.mxu3 %v2204_v35 }
  0x55   :  { %361 = vmatpush.msrb.mxu0 %v2228_v43  ;;  %510 = vmatpush.msrb.mxu2 %v2123_v60 }
  0x56   :  { %379 = vmatpush.msrb.mxu1 %v2241_v46  ;;  %530 = vmatpush.msrb.mxu3 %v2212_v38 }
  0x57   :  { %362 = vmatpush.msrb.mxu0 %v2236_v45  ;;  %511 = vmatpush.msrb.mxu2 %v2129_v1 }
  0x58   :  { %380 = vmatpush.msrb.mxu1 %v2249_v49  ;;  %531 = vmatpush.msrb.mxu3 %v2220_v41 }
  0x59   :  { %363 = vmatpush.msrb.mxu0 %v2244_v47  ;;  %512 = vmatpush.msrb.mxu2 %v2135_v6 }
  0x5a   :  { %364 = vmatmul.f32.vlgmr.msrb.gmra.mxu0 %v2152_v17  ;;  %381 = vmatpush.msrb.mxu1 %v2255_v50 }
  0x5b   :  { %539 = vmatpush.msra.mxu0 %v2155_v18  ;;  %532 = vmatpush.msrb.mxu3 %v2228_v43 }
  0x5c   :  { %382 = vmatpush.msrb.mxu1 %v2260_v51  ;;  %513 = vmatpush.msrb.mxu2 %v2140_v9 }
  0x5d   :  { %540 = vmatpush.msra.mxu0 %v2162_v21  ;;  %533 = vmatpush.msrb.mxu3 %v2236_v45 }
  0x5e   :  { %383 = vmatpush.msrb.mxu1 %v2266_v52  ;;  %514 = vmatpush.msrb.mxu2 %v2147_v14 }
  0x5f   :  { %541 = vmatpush.msra.mxu0 %v2169_v23  ;;  %384 = vmatmul.f32.vlgmr.msrb.gmra.mxu1 %v2152_v17 }
  0x60   :  { %534 = vmatpush.msrb.mxu3 %v2244_v47  ;;  %670 = vmatpush.msra.mxu1 %v2069_v10  ;;  %v199_v10 = vld [vmem:[%s2797_s5] sm:$0x7] }
  0x61   :  { %542 = vmatpush.msra.mxu0 %v2177_v26  ;;  %690 = vmatpush.msra.mxu2 %v2132_v4 }
  0x62   :  { %710 = vmatpush.msra.mxu3 %v2155_v18  ;;  %671 = vmatpush.msra.mxu1 %v2073_v12  ;;  %v202_v12 = vperm.slane %v199_v10, 1 }
  0x63   :  { %543 = vmatpush.msra.mxu0 %v2185_v29  ;;  %691 = vmatpush.msra.mxu2 %v2137_v7 }
  0x64   :  { %711 = vmatpush.msra.mxu3 %v2162_v21  ;;  %672 = vmatpush.msra.mxu1 %v2080_v16  ;;  %v201_v16 = vperm.slane %v199_v10, 0 }
  0x65   :  { %544 = vmatpush.msra.mxu0 %v2193_v31  ;;  %692 = vmatpush.msra.mxu2 %v2143_v11 }
  0x66   :  { %712 = vmatpush.msra.mxu3 %v2169_v23  ;;  %673 = vmatpush.msra.mxu1 %v2087_v20 }
  0x67   :  { %545 = vmatpush.msra.mxu0 %v2201_v34  ;;  %693 = vmatpush.msra.mxu2 %v2150_v15 }
  0x68   :  { %713 = vmatpush.msra.mxu3 %v2177_v26  ;;  %674 = vmatpush.msra.mxu1 %v2094_v24 }
  0x69   :  { %546 = vmatpush.msra.mxu0 %v2209_v36  ;;  %694 = vmatpush.msra.mxu2 %v2158_v19 }
  0x6a   :  { %714 = vmatpush.msra.mxu3 %v2185_v29  ;;  %675 = vmatpush.msra.mxu1 %v2097_v28 }
  0x6b   :  { %547 = vmatpush.msra.mxu0 %v2217_v39  ;;  %695 = vmatpush.msra.mxu2 %v2164_v22 }
  0x6c   :  { %715 = vmatpush.msra.mxu3 %v2193_v31  ;;  %676 = vmatpush.msra.mxu1 %v2100_v32 }
  0x6d   :  { %548 = vmatpush.msra.mxu0 %v2225_v42  ;;  %696 = vmatpush.msra.mxu2 %v2172_v25 }
  0x6e   :  { %716 = vmatpush.msra.mxu3 %v2201_v34  ;;  %677 = vmatpush.msra.mxu1 %v2103_v37  ;;  %v203_v37 = vperm.slane %v199_v10, 2 }
  0x6f   :  { %549 = vmatpush.msra.mxu0 %v2233_v44  ;;  %697 = vmatpush.msra.mxu2 %v2180_v27 }
  0x70   :  { %717 = vmatpush.msra.mxu3 %v2209_v36  ;;  %678 = vmatpush.msra.mxu1 %v2106_v40 }
  0x71   :  { %550 = vmatpush.msra.mxu0 %v2241_v46  ;;  %698 = vmatpush.msra.mxu2 %v2188_v30 }
  0x72   :  { %718 = vmatpush.msra.mxu3 %v2217_v39  ;;  %679 = vmatpush.msra.mxu1 %v2113_v48  ;;  %v320_v48 = vld [vmem:[%s2798_s6] sm:$0x7] }
  0x73   :  { %551 = vmatpush.msra.mxu0 %v2249_v49  ;;  %699 = vmatpush.msra.mxu2 %v2196_v33 }
  0x74   :  { %719 = vmatpush.msra.mxu3 %v2225_v42  ;;  %680 = vmatpush.msra.mxu1 %v2118_v54  ;;  %v322_v54 = vperm.slane %v320_v48, 0 }
  0x75   :  { %552 = vmatpush.msra.mxu0 %v2255_v50  ;;  %700 = vmatpush.msra.mxu2 %v2204_v35 }
  0x76   :  { %720 = vmatpush.msra.mxu3 %v2233_v44  ;;  %681 = vmatpush.msra.mxu1 %v2123_v60  ;;  %v323_v60 = vperm.slane %v320_v48, 1 }
  0x77   :  { %553 = vmatpush.msra.mxu0 %v2260_v51  ;;  %701 = vmatpush.msra.mxu2 %v2212_v38 }
  0x78   :  { %721 = vmatpush.msra.mxu3 %v2241_v46  ;;  %682 = vmatpush.msra.mxu1 %v2129_v1 }
  0x79   :  { %554 = vmatpush.msra.mxu0 %v2266_v52  ;;  %702 = vmatpush.msra.mxu2 %v2220_v41 }
  0x7a   :  { %722 = vmatpush.msra.mxu3 %v2249_v49  ;;  %683 = vmatpush.msra.mxu1 %v2135_v6 }
  0x7b   :  { %703 = vmatpush.msra.mxu2 %v2228_v43 }
  0x7c   :  { %723 = vmatpush.msra.mxu3 %v2255_v50  ;;  %684 = vmatpush.msra.mxu1 %v2140_v9 }
  0x7d   :  { %704 = vmatpush.msra.mxu2 %v2236_v45 }
  0x7e   :  { %724 = vmatpush.msra.mxu3 %v2260_v51  ;;  %685 = vmatpush.msra.mxu1 %v2147_v14 }
  0x7f   :  { %705 = vmatpush.msra.mxu2 %v2244_v47 }
  0x80   :  { %861 = vmatpush.msrb.mxu1 %v2132_v4  ;;  %725 = vmatpush.msra.mxu3 %v2266_v52 }
  0x82   :  { %862 = vmatpush.msrb.mxu1 %v2137_v7  ;;  %v324_v7 = vperm.slane %v320_v48, 2 }
  0x84   :  { %863 = vmatpush.msrb.mxu1 %v2143_v11 }
  0x86   :  { %864 = vmatpush.msrb.mxu1 %v2150_v15 }
  0x88   :  { %865 = vmatpush.msrb.mxu1 %v2158_v19 }
  0x8a   :  { %866 = vmatpush.msrb.mxu1 %v2164_v22 }
  0x8c   :  { %867 = vmatpush.msrb.mxu1 %v2172_v25 }
  0x8e   :  { %868 = vmatpush.msrb.mxu1 %v2180_v27 }
  0x90   :  { %869 = vmatpush.msrb.mxu1 %v2188_v30 }
  0x92   :  { %870 = vmatpush.msrb.mxu1 %v2196_v33 }
  0x94   :  { %871 = vmatpush.msrb.mxu1 %v2204_v35 }
  0x96   :  { %872 = vmatpush.msrb.mxu1 %v2212_v38 }
  0x98   :  { %873 = vmatpush.msrb.mxu1 %v2220_v41 }
  0x9a   :  { %874 = vmatpush.msrb.mxu1 %v2228_v43 }
  0x9c   :  { %875 = vmatpush.msrb.mxu1 %v2236_v45 }
  0x9e   :  { %876 = vmatpush.msrb.mxu1 %v2244_v47 }
  0xba   :  { %v244_v20 = vpop.f32.mrf.mxu1 }
  0xbb   :  { %v224_v24 = vpop.f32.mrf.mxu0  ;;  %v245_v28 = vadd.f32 %v244_v20, %v202_v12 }
  0xbc   :  { %v225_v32 = vadd.f32 %v224_v24, %v201_v16 }
  0xbd   :  { %268 = vst [vmem:[#allocation4 + $0x8] sm:$0xff] %v245_v28  ;;  %v264_v40 = vpop.f32.mrf.mxu2 }
  0xbe   :  { %267 = vst [vmem:[#allocation4] sm:$0xff] %v225_v32  ;;  %v265_v53 = vadd.f32 %v264_v40, %v203_v37 }
  0xc0   :  { %269 = vst [vmem:[#allocation4 + $0x10] sm:$0xff] %v265_v53 }
  0xc2   :  { %v345_v55 = vpop.f32.mrf.mxu3 }
  0xc3   :  { %v346_v56 = vadd.f32 %v345_v55, %v322_v54 }
  0xc7   :  { %v271_v57 = vld [vmem:[#allocation4] ss:$8 sm:$0x7] }
  0xc8   :  { %v388_v58 = vadd.f32 %v346_v56, %v271_v57  ;;  %v409_v1 = vrot.slane %v271_v57, 1  ;;  %v432_v38 = vrot.slane %v271_v57, 2 }
  0xca   :  { %v1734_v59 = vmul.f32 -1.442695, %v388_v58 }
  0xcc   :  { %1761 = vpow2.f32 %v1734_v59 }
  0xd2   :  { %v1762_v61 = vpop.eup %1761 }
  0xd3   :  { %v392_v62 = vadd.f32 1.0, %v1762_v61 }
  0xd5   :  { %1763 = vrcp.f32 %v392_v62  ;;  %v404_v8 = vand.u32 2147483648, %v392_v62  ;;  %vm398_vm0 = vweird.f32 %v392_v62  ;;  %v402_v14 = vand.u32 2147483647, %v392_v62 }
  0xd7   :  { %v365_v63 = vpop.f32.mrf.mxu0  ;;  %v405_v25 = vor.u32 1.1754944e-38, %v404_v8  ;;  %vm403_vm3 = vcmp.eq.f32.partialorder %v402_v14, 8.507059e+37 }
  0xd8   :  { %v366_v0 = vadd.f32 %v365_v63, %v323_v60 }
  0xda   :  { %v411_v2 = vadd.f32 %v409_v1, %v366_v0 }
  0xdb   :  { %v1764_v4 = vpop.eup %1763 }
  0xdc   :  { %v1735_v3 = vmul.f32 -1.442695, %v411_v2  ;;  %v394_v5 = vmul.f32 %v1764_v4, %v392_v62  ;;  %v385_v11 = vpop.f32.mrf.mxu1  ;;  %vm399_vm1 = vweird.f32 %v1764_v4 }
  0xdd   :  { %v386_v22 = vadd.f32 %v385_v11, %v324_v7  ;;  %vm400_vm2 = vmor %vm398_vm0, %vm399_vm1 }
  0xde   :  { %1765 = vpow2.f32 %v1735_v3  ;;  %v395_v6 = vsub.f32 1.0, %v394_v5 }
  0xe0   :  { %v396_v13 = vmul.f32 %v1764_v4, %v395_v6 }
  0xe2   :  { %v397_v19 = vadd.f32 %v1764_v4, %v396_v13 }
  0xe4   :  { %v1766_v9 = vpop.eup %1765  ;;  %v401_v27 = vsel %vm400_vm2, %v1764_v4, %v397_v19 }
  0xe5   :  { %v415_v15 = vadd.f32 1.0, %v1766_v9  ;;  %v406_v30 = vsel %vm403_vm3, %v405_v25, %v401_v27 }
  0xe6   :  { %v431_v33 = vmul.f32 %v406_v30, %v386_v22 }
  0xe7   :  { %1767 = vrcp.f32 %v415_v15  ;;  %v427_v47 = vand.u32 2147483648, %v415_v15  ;;  %v425_v12 = vand.u32 2147483647, %v415_v15  ;;  %vm421_vm5 = vweird.f32 %v415_v15 }
  0xe8   :  { %v434_v43 = vadd.f32 %v432_v38, %v431_v33  ;;  %v2394_v38 = vld [vmem:[#allocation13 + $0x168] sm:$0xff] }
  0xe9   :  { %v428_v20 = vor.u32 1.1754944e-38, %v427_v47  ;;  %vm426_vm7 = vcmp.eq.f32.partialorder %v425_v12, 8.507059e+37  ;;  %841 = vmatpush.msrb.mxu0 %v2394_v38  ;;  %v2414_v47 = vld [vmem:[%s2798_s6] sm:$0x7] }
  0xea   :  { %1769 = vtanh.f32 %v434_v43  ;;  %v2403_v43 = vld [vmem:[#allocation13 + $0x138] sm:$0xff]  ;;  %v664_v12 = vperm.slane %v2414_v47, 0 }
  0xed   :  { %v1768_v35 = vpop.eup %1767 }
  0xee   :  { %v417_v41 = vmul.f32 %v1768_v35, %v415_v15  ;;  %vm422_vm4 = vweird.f32 %v1768_v35 }
  0xef   :  { %vm423_vm6 = vmor %vm421_vm5, %vm422_vm4 }
  0xf0   :  { %v418_v45 = vsub.f32 1.0, %v417_v41  ;;  %v1770_v37 = vpop.eup %1769  ;;  %v2398_v41 = vld [vmem:[#allocation13 + $0x150] sm:$0xff] }
  0xf1   :  { %842 = vmatpush.msrb.mxu0 %v2398_v41 }
  0xf2   :  { %v419_v10 = vmul.f32 %v1768_v35, %v418_v45  ;;  %v2408_v45 = vld [vmem:[#allocation13 + $0x120] sm:$0xff] }
  0xf3   :  { %843 = vmatpush.msrb.mxu0 %v2403_v43 }
  0xf4   :  { %v420_v16 = vadd.f32 %v1768_v35, %v419_v10  ;;  %v2418_v10 = vld [vmem:[#allocation13 + $0x108] sm:$0xff] }
  0xf5   :  { %844 = vmatpush.msrb.mxu0 %v2408_v45 }
  0xf6   :  { %v424_v24 = vsel %vm423_vm6, %v1768_v35, %v420_v16  ;;  %v2424_v16 = vld [vmem:[#allocation13 + $0xf0] sm:$0xff] }
  0xf7   :  { %v429_v28 = vsel %vm426_vm7, %v428_v20, %v424_v24  ;;  %845 = vmatpush.msrb.mxu0 %v2418_v10  ;;  %v2429_v20 = vld [vmem:[#allocation13 + $0xd8] sm:$0xff] }
  0xf8   :  { %v436_v32 = vsub.f32 1.0, %v429_v28  ;;  %v438_v48 = vmul.f32 %v429_v28, %v2152_v17  ;;  %v491_v17 = vld [vmem:[%s2798_s6] sm:$0x7] }
  0xf9   :  { %v495_v61 = vperm.slane %v491_v17, 2  ;;  %846 = vmatpush.msrb.mxu0 %v2424_v16 }
  0xfa   :  { %v437_v40 = vmul.f32 %v1770_v37, %v436_v32  ;;  %v2434_v32 = vld [vmem:[#allocation13 + $0xc0] sm:$0xff] }
  0xfb   :  { %847 = vmatpush.msrb.mxu0 %v2429_v20  ;;  %v2437_v37 = vld [vmem:[#allocation4 + $0x2] ss:$8 sm:$0x7] }
  0xfc   :  { %v2362_v53 = vadd.f32 %v438_v48, %v437_v40  ;;  %v665_v48 = vperm.slane %v2414_v47, 1 }
  0xfd   :  { %848 = vmatpush.msrb.mxu0 %v2434_v32 }
  0xfe   :  { %440 = vst [vmem:[#allocation5] sm:$0x1] %v2362_v53  ;;  %515 = vmatmul.f32.vlgmr.msrb.gmra.mxu2 %v2362_v53  ;;  %535 = vmatmul.f32.vlgmr.msrb.gmra.mxu3 %v2362_v53 }
  0xff   :  { %555 = vmatmul.f32.vlgmr.msra.gmra.mxu0 %v2362_v53  ;;  %881 = vmatpush.msrb.mxu2 %v2155_v18  ;;  %v493_v18 = vperm.slane %v491_v17, 0 }
 0x100   :  { %1012 = vmatpush.msrb.mxu3 %v2394_v38 }
 0x101   :  { %882 = vmatpush.msrb.mxu2 %v2162_v21  ;;  %v494_v21 = vperm.slane %v491_v17, 1 }
 0x102   :  { %1013 = vmatpush.msrb.mxu3 %v2398_v41 }
 0x103   :  { %883 = vmatpush.msrb.mxu2 %v2169_v23  ;;  %v442_v23 = vld [vmem:[#allocation4 + $0x1] ss:$8 sm:$0x7] }
 0x104   :  { %v603_v9 = vrot.slane %v442_v23, 2  ;;  %1014 = vmatpush.msrb.mxu3 %v2403_v43 }
 0x105   :  { %884 = vmatpush.msrb.mxu2 %v2177_v26 }
 0x106   :  { %1015 = vmatpush.msrb.mxu3 %v2408_v45 }
 0x107   :  { %885 = vmatpush.msrb.mxu2 %v2185_v29 }
 0x108   :  { %1016 = vmatpush.msrb.mxu3 %v2418_v10 }
 0x109   :  { %886 = vmatpush.msrb.mxu2 %v2193_v31 }
 0x10a   :  { %1017 = vmatpush.msrb.mxu3 %v2424_v16 }
 0x10b   :  { %887 = vmatpush.msrb.mxu2 %v2201_v34 }
 0x10c   :  { %1018 = vmatpush.msrb.mxu3 %v2429_v20 }
 0x10d   :  { %888 = vmatpush.msrb.mxu2 %v2209_v36  ;;  %v580_v36 = vrot.slane %v442_v23, 1 }
 0x10e   :  { %1019 = vmatpush.msrb.mxu3 %v2434_v32 }
 0x10f   :  { %889 = vmatpush.msrb.mxu2 %v2217_v39 }
 0x111   :  { %890 = vmatpush.msrb.mxu2 %v2225_v42 }
 0x113   :  { %891 = vmatpush.msrb.mxu2 %v2233_v44 }
 0x115   :  { %892 = vmatpush.msrb.mxu2 %v2241_v46 }
 0x117   :  { %893 = vmatpush.msrb.mxu2 %v2249_v49 }
 0x119   :  { %894 = vmatpush.msrb.mxu2 %v2255_v50 }
 0x11b   :  { %895 = vmatpush.msrb.mxu2 %v2260_v51 }
 0x11d   :  { %896 = vmatpush.msrb.mxu2 %v2266_v52 }
 0x17c   :  { %v556_v0 = vpop.f32.mrf.mxu0 }
 0x17d   :  { %v557_v4 = vadd.f32 %v556_v0, %v495_v61 }
 0x181   :  { %v516_v26 = vpop.f32.mrf.mxu2  ;;  %v536_v29 = vpop.f32.mrf.mxu3 }
 0x182   :  { %v517_v31 = vadd.f32 %v516_v26, %v493_v18  ;;  %v537_v34 = vadd.f32 %v536_v29, %v494_v21  ;;  %v2448_v18 = vld [vmem:[#allocation13 + $0x90] sm:$0xff]  ;;  %v751_v26 = vrot.slane %v2437_v37, 1  ;;  %v2454_v29 = vld [vmem:[#allocation13 + $0x78] sm:$0xff] }
 0x184   :  { %v559_v39 = vadd.f32 %v517_v31, %v442_v23  ;;  %v582_v42 = vadd.f32 %v580_v36, %v537_v34  ;;  %v2459_v34 = vld [vmem:[#allocation13 + $0x60] sm:$0xff] }
 0x186   :  { %v1736_v44 = vmul.f32 -1.442695, %v559_v39  ;;  %v1737_v46 = vmul.f32 -1.442695, %v582_v42  ;;  %v2464_v39 = vld [vmem:[#allocation13 + $0x48] sm:$0xff]  ;;  %v2468_v42 = vld [vmem:[#allocation13 + $0x30] sm:$0xff] }
 0x188   :  { %1771 = vpow2.f32 %v1736_v44 }
 0x189   :  { %1773 = vpow2.f32 %v1737_v46  ;;  %v2471_v46 = vld [vmem:[#allocation13 + $0x18] sm:$0xff] }
 0x18e   :  { %v1772_v49 = vpop.eup %1771 }
 0x18f   :  { %v1774_v50 = vpop.eup %1773  ;;  %v563_v51 = vadd.f32 1.0, %v1772_v49 }
 0x190   :  { %v586_v52 = vadd.f32 1.0, %v1774_v50  ;;  %v2476_v50 = vld [vmem:[#allocation13] sm:$0xff] }
 0x191   :  { %1775 = vrcp.f32 %v563_v51  ;;  %v575_v59 = vand.u32 2147483648, %v563_v51  ;;  %v573_v63 = vand.u32 2147483647, %v563_v51  ;;  %vm569_vm9 = vweird.f32 %v563_v51 }
 0x192   :  { %1777 = vrcp.f32 %v586_v52  ;;  %v598_v11 = vand.u32 2147483648, %v586_v52  ;;  %vm592_vm13 = vweird.f32 %v586_v52  ;;  %v596_v13 = vand.u32 2147483647, %v586_v52 }
 0x193   :  { %v576_v3 = vor.u32 1.1754944e-38, %v575_v59  ;;  %vm574_vm11 = vcmp.eq.f32.partialorder %v573_v63, 8.507059e+37 }
 0x194   :  { %v599_v19 = vor.u32 1.1754944e-38, %v598_v11  ;;  %vm597_vm15 = vcmp.eq.f32.partialorder %v596_v13, 8.507059e+37 }
 0x197   :  { %v1776_v54 = vpop.eup %1775 }
 0x198   :  { %v1778_v55 = vpop.eup %1777  ;;  %v565_v56 = vmul.f32 %v1776_v54, %v563_v51  ;;  %vm570_vm8 = vweird.f32 %v1776_v54 }
 0x199   :  { %v588_v57 = vmul.f32 %v1778_v55, %v586_v52  ;;  %vm571_vm10 = vmor %vm569_vm9, %vm570_vm8  ;;  %vm593_vm12 = vweird.f32 %v1778_v55 }
 0x19a   :  { %v566_v58 = vsub.f32 1.0, %v565_v56  ;;  %vm594_vm14 = vmor %vm592_vm13, %vm593_vm12 }
 0x19b   :  { %v589_v60 = vsub.f32 1.0, %v588_v57 }
 0x19c   :  { %v567_v62 = vmul.f32 %v1776_v54, %v566_v58  ;;  %v666_v58 = vperm.slane %v2414_v47, 2 }
 0x19d   :  { %v590_v1 = vmul.f32 %v1778_v55, %v589_v60 }
 0x19e   :  { %v568_v2 = vadd.f32 %v1776_v54, %v567_v62 }
 0x19f   :  { %v591_v7 = vadd.f32 %v1778_v55, %v590_v1 }
 0x1a0   :  { %v572_v5 = vsel %vm571_vm10, %v1776_v54, %v568_v2 }
 0x1a1   :  { %v577_v6 = vsel %vm574_vm11, %v576_v3, %v572_v5  ;;  %v595_v15 = vsel %vm594_vm14, %v1778_v55, %v591_v7 }
 0x1a2   :  { %v602_v8 = vmul.f32 %v577_v6, %v557_v4  ;;  %v600_v22 = vsel %vm597_vm15, %v599_v19, %v595_v15  ;;  %v774_v6 = vrot.slane %v2437_v37, 2 }
 0x1a3   :  { %v607_v25 = vsub.f32 1.0, %v600_v22  ;;  %v609_v33 = vmul.f32 %v600_v22, %v2362_v53  ;;  %v2443_v53 = vld [vmem:[#allocation13 + $0xa8] sm:$0xff] }
 0x1a4   :  { %v605_v14 = vadd.f32 %v603_v9, %v602_v8  ;;  %849 = vmatpush.msrb.mxu0 %v2443_v53  ;;  %1020 = vmatpush.msrb.mxu3 %v2443_v53 }
 0x1a6   :  { %1779 = vtanh.f32 %v605_v14  ;;  %850 = vmatpush.msrb.mxu0 %v2448_v18  ;;  %1021 = vmatpush.msrb.mxu3 %v2448_v18 }
 0x1a8   :  { %851 = vmatpush.msrb.mxu0 %v2454_v29  ;;  %1022 = vmatpush.msrb.mxu3 %v2454_v29 }
 0x1aa   :  { %852 = vmatpush.msrb.mxu0 %v2459_v34  ;;  %1023 = vmatpush.msrb.mxu3 %v2459_v34 }
 0x1ac   :  { %v1780_v27 = vpop.eup %1779  ;;  %853 = vmatpush.msrb.mxu0 %v2464_v39  ;;  %1024 = vmatpush.msrb.mxu3 %v2464_v39 }
 0x1ad   :  { %v608_v30 = vmul.f32 %v1780_v27, %v607_v25 }
 0x1ae   :  { %854 = vmatpush.msrb.mxu0 %v2468_v42  ;;  %1025 = vmatpush.msrb.mxu3 %v2468_v42 }
 0x1af   :  { %v2388_v35 = vadd.f32 %v609_v33, %v608_v30 }
 0x1b0   :  { %855 = vmatpush.msrb.mxu0 %v2471_v46  ;;  %1026 = vmatpush.msrb.mxu3 %v2471_v46 }
 0x1b1   :  { %611 = vst [vmem:[#allocation5 + $0x1] sm:$0x1] %v2388_v35  ;;  %686 = vmatmul.f32.vlgmr.msra.gmra.mxu1 %v2388_v35  ;;  %706 = vmatmul.f32.vlgmr.msra.gmra.mxu2 %v2388_v35 }
 0x1b2   :  { %726 = vmatmul.f32.vlgmr.msra.gmra.mxu3 %v2388_v35  ;;  %1183 = vmatpush.msra.mxu2 %v2394_v38 }
 0x1b3   :  { %856 = vmatpush.msrb.mxu0 %v2476_v50  ;;  %1027 = vmatpush.msrb.mxu3 %v2476_v50 }
 0x1b4   :  { %1184 = vmatpush.msra.mxu2 %v2398_v41 }
 0x1b6   :  { %1185 = vmatpush.msra.mxu2 %v2403_v43 }
 0x1b8   :  { %1186 = vmatpush.msra.mxu2 %v2408_v45 }
 0x1ba   :  { %1187 = vmatpush.msra.mxu2 %v2418_v10 }
 0x1bc   :  { %1188 = vmatpush.msra.mxu2 %v2424_v16 }
 0x1be   :  { %1189 = vmatpush.msra.mxu2 %v2429_v20 }
 0x1c0   :  { %1190 = vmatpush.msra.mxu2 %v2434_v32 }
 0x1c2   :  { %1191 = vmatpush.msra.mxu2 %v2443_v53 }
 0x1c4   :  { %1192 = vmatpush.msra.mxu2 %v2448_v18 }
 0x1c6   :  { %1193 = vmatpush.msra.mxu2 %v2454_v29 }
 0x1c8   :  { %1194 = vmatpush.msra.mxu2 %v2459_v34 }
 0x1ca   :  { %1195 = vmatpush.msra.mxu2 %v2464_v39 }
 0x1cc   :  { %1196 = vmatpush.msra.mxu2 %v2468_v42 }
 0x1ce   :  { %1197 = vmatpush.msra.mxu2 %v2471_v46 }
 0x1d0   :  { %1198 = vmatpush.msra.mxu2 %v2476_v50 }
 0x22e   :  { %v687_v24 = vpop.f32.mrf.mxu1 }
 0x22f   :  { %v688_v28 = vadd.f32 %v687_v24, %v664_v12  ;;  %v2494_v12 = vld [vmem:[#allocation13 + $0x170] sm:$0xff]  ;;  %v2496_v24 = vld [vmem:[#allocation13 + $0x178] sm:$0xff] }
 0x230   :  { %1032 = vmatpush.msra.mxu0 %v2494_v12  ;;  %1052 = vmatpush.msra.mxu1 %v2496_v24 }
 0x231   :  { %v730_v40 = vadd.f32 %v688_v28, %v2437_v37  ;;  %v2500_v28 = vld [vmem:[#allocation13 + $0x158] sm:$0xff]  ;;  %1203 = vmatpush.msra.mxu3 %v2494_v12  ;;  %v2508_v37 = vld [vmem:[#allocation13 + $0x140] sm:$0xff] }
 0x232   :  { %1033 = vmatpush.msra.mxu0 %v2500_v28 }
 0x233   :  { %v1738_v17 = vmul.f32 -1.442695, %v730_v40  ;;  %v2510_v40 = vld [vmem:[#allocation13 + $0x148] sm:$0xff]  ;;  %1204 = vmatpush.msra.mxu3 %v2500_v28 }
 0x234   :  { %v707_v21 = vpop.f32.mrf.mxu2  ;;  %1034 = vmatpush.msra.mxu0 %v2508_v37 }
 0x235   :  { %1781 = vpow2.f32 %v1738_v17  ;;  %v708_v23 = vadd.f32 %v707_v21, %v665_v48  ;;  %v727_v62 = vpop.f32.mrf.mxu3  ;;  %v2516_v48 = vld [vmem:[#allocation13 + $0x128] sm:$0xff]  ;;  %v2518_v17 = vld [vmem:[#allocation13 + $0x130] sm:$0xff]  ;;  %1205 = vmatpush.msra.mxu3 %v2508_v37 }
 0x236   :  { %v728_v3 = vadd.f32 %v727_v62, %v666_v58  ;;  %v2525_v21 = vld [vmem:[%s2798_s6] sm:$0x7]  ;;  %1035 = vmatpush.msra.mxu0 %v2516_v48 }
 0x237   :  { %v753_v31 = vadd.f32 %v751_v26, %v708_v23  ;;  %v2529_v23 = vld [vmem:[#allocation13 + $0x110] sm:$0xff]  ;;  %v2531_v26 = vld [vmem:[#allocation13 + $0x118] sm:$0xff]  ;;  %1206 = vmatpush.msra.mxu3 %v2516_v48 }
 0x238   :  { %1036 = vmatpush.msra.mxu0 %v2529_v23 }
 0x239   :  { %v1739_v36 = vmul.f32 -1.442695, %v753_v31  ;;  %v835_v31 = vperm.slane %v2525_v21, 0  ;;  %1207 = vmatpush.msra.mxu3 %v2529_v23 }
 0x23b   :  { %v1782_v44 = vpop.eup %1781  ;;  %1783 = vpow2.f32 %v1739_v36  ;;  %v836_v36 = vperm.slane %v2525_v21, 1 }
 0x23c   :  { %v734_v49 = vadd.f32 1.0, %v1782_v44  ;;  %v2539_v44 = vld [vmem:[#allocation13 + $0xf8] sm:$0xff] }
 0x23d   :  { %1037 = vmatpush.msra.mxu0 %v2539_v44  ;;  %1208 = vmatpush.msra.mxu3 %v2539_v44 }
 0x23e   :  { %1785 = vrcp.f32 %v734_v49  ;;  %v746_v57 = vand.u32 2147483648, %v734_v49  ;;  %v744_v60 = vand.u32 2147483647, %v734_v49  ;;  %vm740_vm1 = vweird.f32 %v734_v49 }
 0x240   :  { %v747_v1 = vor.u32 1.1754944e-38, %v746_v57  ;;  %vm745_vm3 = vcmp.eq.f32.partialorder %v744_v60, 8.507059e+37  ;;  %v2558_v60 = vld [vmem:[#allocation13 + $0xc8] sm:$0xff] }
 0x241   :  { %v1784_v51 = vpop.eup %1783 }
 0x242   :  { %v757_v52 = vadd.f32 1.0, %v1784_v51  ;;  %v2545_v51 = vld [vmem:[#allocation4 + $0x3] ss:$8 sm:$0x7] }
 0x244   :  { %v1786_v54 = vpop.eup %1785  ;;  %1787 = vrcp.f32 %v757_v52  ;;  %v769_v8 = vand.u32 2147483648, %v757_v52  ;;  %v767_v11 = vand.u32 2147483647, %v757_v52  ;;  %vm763_vm5 = vweird.f32 %v757_v52 }
 0x245   :  { %v736_v55 = vmul.f32 %v1786_v54, %v734_v49  ;;  %vm741_vm0 = vweird.f32 %v1786_v54  ;;  %v2541_v49 = vld [vmem:[#allocation13 + $0x100] sm:$0xff] }
 0x246   :  { %vm742_vm2 = vmor %vm740_vm1, %vm741_vm0  ;;  %v770_v15 = vor.u32 1.1754944e-38, %v769_v8  ;;  %vm768_vm7 = vcmp.eq.f32.partialorder %v767_v11, 8.507059e+37  ;;  %v2591_v8 = vld [vmem:[#allocation13 + $0x68] sm:$0xff]  ;;  %v2599_v11 = vld [vmem:[#allocation13 + $0x50] sm:$0xff] }
 0x247   :  { %v737_v56 = vsub.f32 1.0, %v736_v55 }
 0x249   :  { %v738_v59 = vmul.f32 %v1786_v54, %v737_v56 }
 0x24a   :  { %v1788_v61 = vpop.eup %1787 }
 0x24b   :  { %v759_v63 = vmul.f32 %v1788_v61, %v757_v52  ;;  %v739_v0 = vadd.f32 %v1786_v54, %v738_v59  ;;  %vm764_vm4 = vweird.f32 %v1788_v61  ;;  %v2549_v52 = vld [vmem:[#allocation13 + $0xe0] sm:$0xff]  ;;  %v922_v59 = vrot.slane %v2545_v51, 1 }
 0x24c   :  { %vm765_vm6 = vmor %vm763_vm5, %vm764_vm4  ;;  %1038 = vmatpush.msra.mxu0 %v2549_v52  ;;  %1209 = vmatpush.msra.mxu3 %v2549_v52 }
 0x24d   :  { %v760_v2 = vsub.f32 1.0, %v759_v63  ;;  %v743_v4 = vsel %vm742_vm2, %v1786_v54, %v739_v0  ;;  %v2551_v54 = vld [vmem:[#allocation13 + $0xe8] sm:$0xff]  ;;  %v2567_v0 = vld [vmem:[#allocation13 + $0xb0] sm:$0xff] }
 0x24e   :  { %v748_v5 = vsel %vm745_vm3, %v747_v1, %v743_v4  ;;  %1039 = vmatpush.msra.mxu0 %v2558_v60  ;;  %v2569_v1 = vld [vmem:[#allocation13 + $0xb8] sm:$0xff]  ;;  %1210 = vmatpush.msra.mxu3 %v2558_v60 }
 0x24f   :  { %v761_v7 = vmul.f32 %v1788_v61, %v760_v2  ;;  %v773_v9 = vmul.f32 %v748_v5, %v728_v3  ;;  %v2575_v4 = vld [vmem:[#allocation13 + $0x98] sm:$0xff]  ;;  %v2577_v5 = vld [vmem:[#allocation13 + $0xa0] sm:$0xff] }
 0x250   :  { %1040 = vmatpush.msra.mxu0 %v2567_v0  ;;  %1211 = vmatpush.msra.mxu3 %v2567_v0 }
 0x251   :  { %v762_v13 = vadd.f32 %v1788_v61, %v761_v7  ;;  %v776_v14 = vadd.f32 %v774_v6, %v773_v9  ;;  %v2583_v6 = vld [vmem:[#allocation13 + $0x80] sm:$0xff]  ;;  %v2585_v7 = vld [vmem:[#allocation13 + $0x88] sm:$0xff]  ;;  %v2593_v9 = vld [vmem:[#allocation13 + $0x70] sm:$0xff] }
 0x252   :  { %1041 = vmatpush.msra.mxu0 %v2575_v4  ;;  %1212 = vmatpush.msra.mxu3 %v2575_v4 }
 0x253   :  { %v766_v19 = vsel %vm765_vm6, %v1788_v61, %v762_v13  ;;  %1789 = vtanh.f32 %v776_v14  ;;  %v2560_v61 = vld [vmem:[#allocation13 + $0xd0] sm:$0xff]  ;;  %v2601_v13 = vld [vmem:[#allocation13 + $0x58] sm:$0xff] }
 0x254   :  { %v771_v22 = vsel %vm768_vm7, %v770_v15, %v766_v19  ;;  %1042 = vmatpush.msra.mxu0 %v2583_v6  ;;  %1213 = vmatpush.msra.mxu3 %v2583_v6  ;;  %v2607_v14 = vld [vmem:[#allocation13 + $0x38] sm:$0xff]  ;;  %v2609_v15 = vld [vmem:[#allocation13 + $0x40] sm:$0xff] }
 0x255   :  { %v778_v25 = vsub.f32 1.0, %v771_v22  ;;  %v780_v33 = vmul.f32 %v771_v22, %v2388_v35  ;;  %v2502_v35 = vld [vmem:[#allocation13 + $0x160] sm:$0xff] }
 0x256   :  { %1053 = vmatpush.msra.mxu1 %v2502_v35  ;;  %1043 = vmatpush.msra.mxu0 %v2591_v8  ;;  %v2611_v22 = vld [vmem:[#allocation13 + $0x20] sm:$0xff] }
 0x257   :  { %1214 = vmatpush.msra.mxu3 %v2591_v8 }
 0x258   :  { %1054 = vmatpush.msra.mxu1 %v2510_v40  ;;  %1044 = vmatpush.msra.mxu0 %v2599_v11 }
 0x259   :  { %v1790_v27 = vpop.eup %1789  ;;  %1215 = vmatpush.msra.mxu3 %v2599_v11 }
 0x25a   :  { %v779_v30 = vmul.f32 %v1790_v27, %v778_v25  ;;  %1055 = vmatpush.msra.mxu1 %v2518_v17  ;;  %v2613_v25 = vld [vmem:[#allocation13 + $0x28] sm:$0xff]  ;;  %1045 = vmatpush.msra.mxu0 %v2607_v14 }
 0x25b   :  { %1216 = vmatpush.msra.mxu3 %v2607_v14 }
 0x25c   :  { %v2488_v47 = vadd.f32 %v780_v33, %v779_v30  ;;  %1056 = vmatpush.msra.mxu1 %v2531_v26  ;;  %1046 = vmatpush.msra.mxu0 %v2611_v22 }
 0x25d   :  { %1217 = vmatpush.msra.mxu3 %v2611_v22 }
 0x25e   :  { %782 = vst [vmem:[#allocation5 + $0x2] sm:$0x1] %v2488_v47  ;;  %857 = vmatmul.f32.vlgmr.msrb.gmra.mxu0 %v2488_v47  ;;  %877 = vmatmul.f32.vlgmr.msrb.gmra.mxu1 %v2488_v47 }
 0x25f   :  { %897 = vmatmul.f32.vlgmr.msrb.gmra.mxu2 %v2488_v47  ;;  %1057 = vmatpush.msra.mxu1 %v2541_v49 }
 0x260   :  { %1374 = vmatpush.msrb.mxu2 %v2494_v12 }
 0x261   :  { %1058 = vmatpush.msra.mxu1 %v2551_v54 }
 0x262   :  { %1375 = vmatpush.msrb.mxu2 %v2500_v28 }
 0x263   :  { %1059 = vmatpush.msra.mxu1 %v2560_v61 }
 0x264   :  { %1376 = vmatpush.msrb.mxu2 %v2508_v37 }
 0x265   :  { %1060 = vmatpush.msra.mxu1 %v2569_v1 }
 0x266   :  { %1377 = vmatpush.msrb.mxu2 %v2516_v48 }
 0x267   :  { %1061 = vmatpush.msra.mxu1 %v2577_v5 }
 0x268   :  { %1378 = vmatpush.msrb.mxu2 %v2529_v23 }
 0x269   :  { %1062 = vmatpush.msra.mxu1 %v2585_v7 }
 0x26a   :  { %1379 = vmatpush.msrb.mxu2 %v2539_v44 }
 0x26b   :  { %1063 = vmatpush.msra.mxu1 %v2593_v9 }
 0x26c   :  { %1380 = vmatpush.msrb.mxu2 %v2549_v52 }
 0x26d   :  { %1064 = vmatpush.msra.mxu1 %v2601_v13 }
 0x26e   :  { %1381 = vmatpush.msrb.mxu2 %v2558_v60 }
 0x26f   :  { %1065 = vmatpush.msra.mxu1 %v2609_v15 }
 0x270   :  { %1382 = vmatpush.msrb.mxu2 %v2567_v0 }
 0x271   :  { %1066 = vmatpush.msra.mxu1 %v2613_v25 }
 0x272   :  { %1383 = vmatpush.msrb.mxu2 %v2575_v4 }
 0x274   :  { %1384 = vmatpush.msrb.mxu2 %v2583_v6 }
 0x276   :  { %1385 = vmatpush.msrb.mxu2 %v2591_v8 }
 0x278   :  { %1386 = vmatpush.msrb.mxu2 %v2599_v11 }
 0x27a   :  { %1387 = vmatpush.msrb.mxu2 %v2607_v14 }
 0x27c   :  { %1388 = vmatpush.msrb.mxu2 %v2611_v22 }
 0x2db   :  { %v858_v55 = vpop.f32.mrf.mxu0  ;;  %v878_v56 = vpop.f32.mrf.mxu1 }
 0x2dc   :  { %v859_v57 = vadd.f32 %v858_v55, %v835_v31  ;;  %v879_v58 = vadd.f32 %v878_v56, %v836_v36  ;;  %v2621_v31 = vld [vmem:[#allocation13 + $0x8] sm:$0xff]  ;;  %v2623_v36 = vld [vmem:[#allocation13 + $0x10] sm:$0xff] }
 0x2dd   :  { %1047 = vmatpush.msra.mxu0 %v2621_v31  ;;  %1067 = vmatpush.msra.mxu1 %v2623_v36 }
 0x2de   :  { %v901_v62 = vadd.f32 %v859_v57, %v2545_v51  ;;  %v924_v63 = vadd.f32 %v922_v59, %v879_v58  ;;  %1218 = vmatpush.msra.mxu3 %v2621_v31  ;;  %1389 = vmatpush.msrb.mxu2 %v2621_v31 }
 0x2df   :  { %1223 = vmatpush.msrb.mxu0 %v2496_v24  ;;  %1354 = vmatpush.msrb.mxu1 %v2394_v38 }
 0x2e0   :  { %v1740_v2 = vmul.f32 -1.442695, %v901_v62  ;;  %v1741_v3 = vmul.f32 -1.442695, %v924_v63  ;;  %v837_v63 = vperm.slane %v2525_v21, 2 }
 0x2e1   :  { %1224 = vmatpush.msrb.mxu0 %v2502_v35  ;;  %1355 = vmatpush.msrb.mxu1 %v2398_v41 }
 0x2e2   :  { %1791 = vpow2.f32 %v1740_v2 }
 0x2e3   :  { %1793 = vpow2.f32 %v1741_v3  ;;  %1225 = vmatpush.msrb.mxu0 %v2510_v40  ;;  %1356 = vmatpush.msrb.mxu1 %v2403_v43 }
 0x2e5   :  { %1226 = vmatpush.msrb.mxu0 %v2518_v17  ;;  %1357 = vmatpush.msrb.mxu1 %v2408_v45 }
 0x2e7   :  { %1227 = vmatpush.msrb.mxu0 %v2531_v26  ;;  %1358 = vmatpush.msrb.mxu1 %v2418_v10 }
 0x2e8   :  { %v1792_v19 = vpop.eup %1791 }
 0x2e9   :  { %v1794_v27 = vpop.eup %1793  ;;  %v905_v30 = vadd.f32 1.0, %v1792_v19  ;;  %v898_v19 = vpop.f32.mrf.mxu2  ;;  %1228 = vmatpush.msrb.mxu0 %v2541_v49  ;;  %1359 = vmatpush.msrb.mxu1 %v2424_v16 }
 0x2ea   :  { %v2619_v33 = vadd.f32 1.0, %v1794_v27  ;;  %v899_v45 = vadd.f32 %v898_v19, %v837_v63 }
 0x2eb   :  { %1795 = vrcp.f32 %v905_v30  ;;  %v917_v38 = vand.u32 2147483648, %v905_v30  ;;  %v915_v41 = vand.u32 2147483647, %v905_v30  ;;  %vm911_vm9 = vweird.f32 %v905_v30  ;;  %1229 = vmatpush.msrb.mxu0 %v2551_v54  ;;  %1360 = vmatpush.msrb.mxu1 %v2429_v20 }
 0x2ec   :  { %1797 = vrcp.f32 %v2619_v33  ;;  %v940_v10 = vand.u32 2147483648, %v2619_v33  ;;  %vm934_vm13 = vweird.f32 %v2619_v33  ;;  %v938_v16 = vand.u32 2147483647, %v2619_v33 }
 0x2ed   :  { %v918_v43 = vor.u32 1.1754944e-38, %v917_v38  ;;  %vm916_vm11 = vcmp.eq.f32.partialorder %v915_v41, 8.507059e+37  ;;  %1230 = vmatpush.msrb.mxu0 %v2560_v61  ;;  %1361 = vmatpush.msrb.mxu1 %v2434_v32 }
 0x2ee   :  { %v941_v20 = vor.u32 1.1754944e-38, %v940_v10  ;;  %vm939_vm15 = vcmp.eq.f32.partialorder %v938_v16, 8.507059e+37 }
 0x2ef   :  { %1231 = vmatpush.msrb.mxu0 %v2569_v1  ;;  %1362 = vmatpush.msrb.mxu1 %v2443_v53 }
 0x2f1   :  { %v1796_v55 = vpop.eup %1795  ;;  %1232 = vmatpush.msrb.mxu0 %v2577_v5  ;;  %1363 = vmatpush.msrb.mxu1 %v2448_v18 }
 0x2f2   :  { %v1798_v56 = vpop.eup %1797  ;;  %v907_v57 = vmul.f32 %v1796_v55, %v905_v30  ;;  %vm912_vm8 = vweird.f32 %v1796_v55  ;;  %v945_v30 = vrot.slane %v2545_v51, 2 }
 0x2f3   :  { %v930_v58 = vmul.f32 %v1798_v56, %v2619_v33  ;;  %vm913_vm10 = vmor %vm911_vm9, %vm912_vm8  ;;  %vm935_vm12 = vweird.f32 %v1798_v56  ;;  %1233 = vmatpush.msrb.mxu0 %v2585_v7  ;;  %1364 = vmatpush.msrb.mxu1 %v2454_v29  ;;  %v1004_v29 = vld [vmem:[%s2798_s6] sm:$0x7] }
 0x2f4   :  { %v908_v59 = vsub.f32 1.0, %v907_v57  ;;  %vm936_vm14 = vmor %vm934_vm13, %vm935_vm12  ;;  %v1008_v63 = vperm.slane %v1004_v29, 2 }
 0x2f5   :  { %v931_v62 = vsub.f32 1.0, %v930_v58  ;;  %1234 = vmatpush.msrb.mxu0 %v2593_v9  ;;  %1365 = vmatpush.msrb.mxu1 %v2459_v34  ;;  %v1007_v34 = vperm.slane %v1004_v29, 1 }
 0x2f6   :  { %v909_v2 = vmul.f32 %v1796_v55, %v908_v59 }
 0x2f7   :  { %v932_v3 = vmul.f32 %v1798_v56, %v931_v62  ;;  %1235 = vmatpush.msrb.mxu0 %v2601_v13  ;;  %1366 = vmatpush.msrb.mxu1 %v2464_v39  ;;  %v955_v39 = vld [vmem:[#allocation4 + $0x4] ss:$8 sm:$0x7] }
 0x2f8   :  { %v910_v27 = vadd.f32 %v1796_v55, %v909_v2 }
 0x2f9   :  { %v933_v58 = vadd.f32 %v1798_v56, %v932_v3  ;;  %1236 = vmatpush.msrb.mxu0 %v2609_v15  ;;  %1367 = vmatpush.msrb.mxu1 %v2468_v42 }
 0x2fa   :  { %v914_v57 = vsel %vm913_vm10, %v1796_v55, %v910_v27 }
 0x2fb   :  { %v919_v21 = vsel %vm916_vm11, %v918_v43, %v914_v57  ;;  %v937_v62 = vsel %vm936_vm14, %v1798_v56, %v933_v58  ;;  %1237 = vmatpush.msrb.mxu0 %v2613_v25  ;;  %1368 = vmatpush.msrb.mxu1 %v2471_v46 }
 0x2fc   :  { %v944_v59 = vmul.f32 %v919_v21, %v899_v45  ;;  %v942_v51 = vsel %vm939_vm15, %v941_v20, %v937_v62 }
 0x2fd   :  { %v949_v32 = vsub.f32 1.0, %v942_v51  ;;  %v951_v56 = vmul.f32 %v942_v51, %v2488_v47  ;;  %1238 = vmatpush.msrb.mxu0 %v2623_v36  ;;  %1369 = vmatpush.msrb.mxu1 %v2476_v50  ;;  %v1093_v50 = vrot.slane %v955_v39, 1 }
 0x2fe   :  { %v947_v55 = vadd.f32 %v945_v30, %v944_v59  ;;  %v1116_v59 = vrot.slane %v955_v39, 2 }
 0x300   :  { %1799 = vtanh.f32 %v947_v55 }
 0x306   :  { %v1800_v33 = vpop.eup %1799 }
 0x307   :  { %v950_v53 = vmul.f32 %v1800_v33, %v949_v32 }
 0x309   :  { %v2670_v18 = vadd.f32 %v951_v56, %v950_v53 }
 0x30b   :  { %953 = vst [vmem:[#allocation5 + $0x3] sm:$0x1] %v2670_v18  ;;  %1028 = vmatmul.f32.vlgmr.msrb.gmra.mxu3 %v2670_v18  ;;  %1048 = vmatmul.f32.vlgmr.msra.gmra.mxu0 %v2670_v18 }
 0x30c   :  { %1068 = vmatmul.f32.vlgmr.msra.gmra.mxu1 %v2670_v18  ;;  %1394 = vmatpush.msrb.mxu3 %v2496_v24 }
 0x30d   :  { %1545 = vmatpush.msra.mxu1 %v2494_v12  ;;  %v1006_v12 = vperm.slane %v1004_v29, 0 }
 0x30e   :  { %1395 = vmatpush.msrb.mxu3 %v2502_v35 }
 0x30f   :  { %1546 = vmatpush.msra.mxu1 %v2500_v28 }
 0x310   :  { %1396 = vmatpush.msrb.mxu3 %v2510_v40 }
 0x311   :  { %1547 = vmatpush.msra.mxu1 %v2508_v37 }
 0x312   :  { %1397 = vmatpush.msrb.mxu3 %v2518_v17 }
 0x313   :  { %1548 = vmatpush.msra.mxu1 %v2516_v48 }
 0x314   :  { %1398 = vmatpush.msrb.mxu3 %v2531_v26 }
 0x315   :  { %1549 = vmatpush.msra.mxu1 %v2529_v23 }
 0x316   :  { %1399 = vmatpush.msrb.mxu3 %v2541_v49 }
 0x317   :  { %1550 = vmatpush.msra.mxu1 %v2539_v44 }
 0x318   :  { %1400 = vmatpush.msrb.mxu3 %v2551_v54 }
 0x319   :  { %1551 = vmatpush.msra.mxu1 %v2549_v52 }
 0x31a   :  { %1401 = vmatpush.msrb.mxu3 %v2560_v61 }
 0x31b   :  { %1552 = vmatpush.msra.mxu1 %v2558_v60 }
 0x31c   :  { %1402 = vmatpush.msrb.mxu3 %v2569_v1 }
 0x31d   :  { %1553 = vmatpush.msra.mxu1 %v2567_v0 }
 0x31e   :  { %1403 = vmatpush.msrb.mxu3 %v2577_v5 }
 0x31f   :  { %1554 = vmatpush.msra.mxu1 %v2575_v4 }
 0x320   :  { %1404 = vmatpush.msrb.mxu3 %v2585_v7 }
 0x321   :  { %1555 = vmatpush.msra.mxu1 %v2583_v6 }
 0x322   :  { %1405 = vmatpush.msrb.mxu3 %v2593_v9 }
 0x323   :  { %1556 = vmatpush.msra.mxu1 %v2591_v8 }
 0x324   :  { %1406 = vmatpush.msrb.mxu3 %v2601_v13 }
 0x325   :  { %1557 = vmatpush.msra.mxu1 %v2599_v11 }
 0x326   :  { %1407 = vmatpush.msrb.mxu3 %v2609_v15 }
 0x327   :  { %1558 = vmatpush.msra.mxu1 %v2607_v14 }
 0x328   :  { %1408 = vmatpush.msrb.mxu3 %v2613_v25 }
 0x329   :  { %1559 = vmatpush.msra.mxu1 %v2611_v22 }
 0x32a   :  { %1409 = vmatpush.msrb.mxu3 %v2623_v36 }
 0x32b   :  { %1560 = vmatpush.msra.mxu1 %v2621_v31 }
 0x388   :  { %v1049_v42 = vpop.f32.mrf.mxu0 }
 0x389   :  { %v1050_v46 = vadd.f32 %v1049_v42, %v1007_v34  ;;  %v1069_v19 = vpop.f32.mrf.mxu1 }
 0x38a   :  { %v1070_v45 = vadd.f32 %v1069_v19, %v1008_v63 }
 0x38b   :  { %v1095_v47 = vadd.f32 %v1093_v50, %v1050_v46 }
 0x38d   :  { %v1743_v28 = vmul.f32 -1.442695, %v1095_v47 }
 0x38e   :  { %v1029_v37 = vpop.f32.mrf.mxu3 }
 0x38f   :  { %1801 = vpow2.f32 %v1743_v28  ;;  %v1030_v48 = vadd.f32 %v1029_v37, %v1006_v12 }
 0x391   :  { %v1072_v23 = vadd.f32 %v1030_v48, %v955_v39 }
 0x393   :  { %v1742_v44 = vmul.f32 -1.442695, %v1072_v23 }
 0x395   :  { %v1802_v52 = vpop.eup %1801  ;;  %1803 = vpow2.f32 %v1742_v44 }
 0x396   :  { %v1099_v60 = vadd.f32 1.0, %v1802_v52 }
 0x398   :  { %1805 = vrcp.f32 %v1099_v60  ;;  %v1111_v10 = vand.u32 2147483648, %v1099_v60  ;;  %vm1105_vm5 = vweird.f32 %v1099_v60  ;;  %v1109_v16 = vand.u32 2147483647, %v1099_v60 }
 0x39a   :  { %v1112_v20 = vor.u32 1.1754944e-38, %v1111_v10  ;;  %vm1110_vm7 = vcmp.eq.f32.partialorder %v1109_v16, 8.507059e+37  ;;  %v1505_v10 = vld [vmem:[#allocation13 + $0x120] sm:$0xff] }
 0x39b   :  { %v1804_v0 = vpop.eup %1803 }
 0x39c   :  { %v1076_v4 = vadd.f32 1.0, %v1804_v0 }
 0x39e   :  { %1807 = vrcp.f32 %v1076_v4  ;;  %v1806_v6 = vpop.eup %1805  ;;  %v1088_v38 = vand.u32 2147483648, %v1076_v4  ;;  %v1086_v41 = vand.u32 2147483647, %v1076_v4  ;;  %vm1082_vm1 = vweird.f32 %v1076_v4 }
 0x39f   :  { %v1101_v8 = vmul.f32 %v1806_v6, %v1099_v60  ;;  %vm1106_vm4 = vweird.f32 %v1806_v6 }
 0x3a0   :  { %v1089_v43 = vor.u32 1.1754944e-38, %v1088_v38  ;;  %vm1087_vm3 = vcmp.eq.f32.partialorder %v1086_v41, 8.507059e+37  ;;  %vm1107_vm6 = vmor %vm1105_vm5, %vm1106_vm4 }
 0x3a1   :  { %v1102_v22 = vsub.f32 1.0, %v1101_v8 }
 0x3a3   :  { %v1103_v3 = vmul.f32 %v1806_v6, %v1102_v22 }
 0x3a4   :  { %v1808_v11 = vpop.eup %1807 }
 0x3a5   :  { %v1078_v14 = vmul.f32 %v1808_v11, %v1076_v4  ;;  %vm1083_vm0 = vweird.f32 %v1808_v11  ;;  %v1104_v58 = vadd.f32 %v1806_v6, %v1103_v3 }
 0x3a6   :  { %vm1084_vm2 = vmor %vm1082_vm1, %vm1083_vm0 }
 0x3a7   :  { %v1079_v31 = vsub.f32 1.0, %v1078_v14  ;;  %v1108_v62 = vsel %vm1107_vm6, %v1806_v6, %v1104_v58  ;;  %v1508_v58 = vld [vmem:[#allocation13 + $0x138] sm:$0xff] }
 0x3a8   :  { %v1113_v51 = vsel %vm1110_vm7, %v1112_v20, %v1108_v62  ;;  %v1496_v62 = vld [vmem:[#allocation13 + $0xd8] sm:$0xff] }
 0x3a9   :  { %v1080_v2 = vmul.f32 %v1808_v11, %v1079_v31  ;;  %v1120_v32 = vsub.f32 1.0, %v1113_v51  ;;  %v1122_v56 = vmul.f32 %v1113_v51, %v2670_v18 }
 0x3ab   :  { %v1081_v27 = vadd.f32 %v1808_v11, %v1080_v2 }
 0x3ad   :  { %v1085_v57 = vsel %vm1084_vm2, %v1808_v11, %v1081_v27 }
 0x3ae   :  { %v1090_v21 = vsel %vm1087_vm3, %v1089_v43, %v1085_v57  ;;  %v1514_v57 = vld [vmem:[#allocation13 + $0x168] sm:$0xff] }
 0x3af   :  { %v1115_v30 = vmul.f32 %v1090_v21, %v1070_v45  ;;  %1525 = vmatpush.msra.mxu0 %v1514_v57  ;;  %v1511_v21 = vld [vmem:[#allocation13 + $0x150] sm:$0xff] }
 0x3b1   :  { %v1118_v55 = vadd.f32 %v1116_v59, %v1115_v30  ;;  %1526 = vmatpush.msra.mxu0 %v1511_v21  ;;  %v2752_v59 = vld [vmem:[%s2798_s6] sm:$0x7]  ;;  %v1502_v30 = vld [vmem:[#allocation13 + $0x108] sm:$0xff] }
 0x3b2   :  { %v1348_v16 = vperm.slane %v2752_v59, 0  ;;  %v2772_v21 = vld [vmem:[%s2798_s6] sm:$0x7] }
 0x3b3   :  { %1809 = vtanh.f32 %v1118_v55  ;;  %1527 = vmatpush.msra.mxu0 %v1508_v58  ;;  %v1499_v55 = vld [vmem:[#allocation13 + $0xf0] sm:$0xff]  ;;  %v1656_v58 = vld [vmem:[#allocation14 + $0x78] sm:$0xff] }
 0x3b5   :  { %1528 = vmatpush.msra.mxu0 %v1505_v10  ;;  %v1519_v10 = vperm.slane %v2772_v21, 0 }
 0x3b7   :  { %1529 = vmatpush.msra.mxu0 %v1502_v30  ;;  %v2776_v30 = vld [vmem:[#allocation4 + $0x7] ss:$8 sm:$0x7] }
 0x3b9   :  { %v1810_v33 = vpop.eup %1809  ;;  %1530 = vmatpush.msra.mxu0 %v1499_v55 }
 0x3ba   :  { %v1121_v53 = vmul.f32 %v1810_v33, %v1120_v32  ;;  %v1493_v32 = vld [vmem:[#allocation13 + $0xc0] sm:$0xff] }
 0x3bb   :  { %1531 = vmatpush.msra.mxu0 %v1496_v62  ;;  %v2755_v33 = vld [vmem:[#allocation4 + $0x6] ss:$8 sm:$0x7] }
 0x3bc   :  { %v2717_v29 = vadd.f32 %v1122_v56, %v1121_v53  ;;  %v1349_v56 = vperm.slane %v2752_v59, 1 }
 0x3bd   :  { %1532 = vmatpush.msra.mxu0 %v1493_v32  ;;  %v1606_v32 = vrot.slane %v2776_v30, 1 }
 0x3be   :  { %1124 = vst [vmem:[#allocation5 + $0x4] sm:$0x1] %v2717_v29  ;;  %1199 = vmatmul.f32.vlgmr.msra.gmra.mxu2 %v2717_v29  ;;  %1219 = vmatmul.f32.vlgmr.msra.gmra.mxu3 %v2717_v29 }
 0x3bf   :  { %1239 = vmatmul.f32.vlgmr.msrb.gmra.mxu0 %v2717_v29  ;;  %1565 = vmatpush.msra.mxu2 %v2496_v24  ;;  %v1175_v24 = vld [vmem:[%s2798_s6] sm:$0x7] }
 0x3c0   :  { %v1179_v28 = vperm.slane %v1175_v24, 2  ;;  %1661 = vmatpush.msra.mxu3 %v1656_v58 }
 0x3c1   :  { %1566 = vmatpush.msra.mxu2 %v2502_v35  ;;  %v1177_v35 = vperm.slane %v1175_v24, 0 }
 0x3c3   :  { %1567 = vmatpush.msra.mxu2 %v2510_v40  ;;  %v1178_v40 = vperm.slane %v1175_v24, 1 }
 0x3c5   :  { %1568 = vmatpush.msra.mxu2 %v2518_v17  ;;  %v1126_v17 = vld [vmem:[#allocation4 + $0x5] ss:$8 sm:$0x7] }
 0x3c6   :  { %v1287_v14 = vrot.slane %v1126_v17, 2 }
 0x3c7   :  { %1569 = vmatpush.msra.mxu2 %v2531_v26 }
 0x3c9   :  { %1570 = vmatpush.msra.mxu2 %v2541_v49 }
 0x3cb   :  { %1571 = vmatpush.msra.mxu2 %v2551_v54 }
 0x3cd   :  { %1572 = vmatpush.msra.mxu2 %v2560_v61 }
 0x3cf   :  { %1573 = vmatpush.msra.mxu2 %v2569_v1  ;;  %v1264_v1 = vrot.slane %v1126_v17, 1 }
 0x3d1   :  { %1574 = vmatpush.msra.mxu2 %v2577_v5 }
 0x3d3   :  { %1575 = vmatpush.msra.mxu2 %v2585_v7 }
 0x3d5   :  { %1576 = vmatpush.msra.mxu2 %v2593_v9 }
 0x3d7   :  { %1577 = vmatpush.msra.mxu2 %v2601_v13 }
 0x3d9   :  { %1578 = vmatpush.msra.mxu2 %v2609_v15 }
 0x3db   :  { %1579 = vmatpush.msra.mxu2 %v2613_v25 }
 0x3dd   :  { %1580 = vmatpush.msra.mxu2 %v2623_v36 }
 0x43c   :  { %v1240_v23 = vpop.f32.mrf.mxu0 }
 0x43d   :  { %v1241_v0 = vadd.f32 %v1240_v23, %v1179_v28 }
 0x441   :  { %v1200_v26 = vpop.f32.mrf.mxu2  ;;  %v1220_v49 = vpop.f32.mrf.mxu3 }
 0x442   :  { %v1201_v54 = vadd.f32 %v1200_v26, %v1177_v35  ;;  %v1221_v61 = vadd.f32 %v1220_v49, %v1178_v40  ;;  %v1487_v35 = vld [vmem:[#allocation13 + $0x90] sm:$0xff]  ;;  %v1435_v26 = vrot.slane %v2755_v33, 1  ;;  %v1484_v49 = vld [vmem:[#allocation13 + $0x78] sm:$0xff] }
 0x444   :  { %v1243_v5 = vadd.f32 %v1201_v54, %v1126_v17  ;;  %v1266_v7 = vadd.f32 %v1264_v1, %v1221_v61  ;;  %v1481_v61 = vld [vmem:[#allocation13 + $0x60] sm:$0xff] }
 0x446   :  { %v1744_v9 = vmul.f32 -1.442695, %v1243_v5  ;;  %v1745_v13 = vmul.f32 -1.442695, %v1266_v7  ;;  %v1478_v5 = vld [vmem:[#allocation13 + $0x48] sm:$0xff]  ;;  %v1475_v7 = vld [vmem:[#allocation13 + $0x30] sm:$0xff] }
 0x448   :  { %1811 = vpow2.f32 %v1744_v9 }
 0x449   :  { %1813 = vpow2.f32 %v1745_v13  ;;  %v1472_v13 = vld [vmem:[#allocation13 + $0x18] sm:$0xff] }
 0x44e   :  { %v1812_v15 = vpop.eup %1811 }
 0x44f   :  { %v1814_v25 = vpop.eup %1813  ;;  %v1247_v36 = vadd.f32 1.0, %v1812_v15 }
 0x450   :  { %v1270_v18 = vadd.f32 1.0, %v1814_v25  ;;  %v1469_v25 = vld [vmem:[#allocation13] sm:$0xff] }
 0x451   :  { %1815 = vrcp.f32 %v1247_v36  ;;  %v1259_v47 = vand.u32 2147483648, %v1247_v36  ;;  %v1257_v48 = vand.u32 2147483647, %v1247_v36  ;;  %vm1253_vm9 = vweird.f32 %v1247_v36 }
 0x452   :  { %1817 = vrcp.f32 %v1270_v18  ;;  %v1282_v22 = vand.u32 2147483648, %v1270_v18  ;;  %vm1276_vm13 = vweird.f32 %v1270_v18  ;;  %v1280_v31 = vand.u32 2147483647, %v1270_v18 }
 0x453   :  { %v1260_v60 = vor.u32 1.1754944e-38, %v1259_v47  ;;  %vm1258_vm11 = vcmp.eq.f32.partialorder %v1257_v48, 8.507059e+37 }
 0x454   :  { %v1283_v2 = vor.u32 1.1754944e-38, %v1282_v22  ;;  %vm1281_vm15 = vcmp.eq.f32.partialorder %v1280_v31, 8.507059e+37 }
 0x457   :  { %v1816_v34 = vpop.eup %1815 }
 0x458   :  { %v1818_v39 = vpop.eup %1817  ;;  %v1249_v42 = vmul.f32 %v1816_v34, %v1247_v36  ;;  %vm1254_vm8 = vweird.f32 %v1816_v34 }
 0x459   :  { %v1272_v46 = vmul.f32 %v1818_v39, %v1270_v18  ;;  %vm1255_vm10 = vmor %vm1253_vm9, %vm1254_vm8  ;;  %vm1277_vm12 = vweird.f32 %v1818_v39 }
 0x45a   :  { %v1250_v50 = vsub.f32 1.0, %v1249_v42  ;;  %vm1278_vm14 = vmor %vm1276_vm13, %vm1277_vm12 }
 0x45b   :  { %v1273_v12 = vsub.f32 1.0, %v1272_v46 }
 0x45c   :  { %v1251_v37 = vmul.f32 %v1816_v34, %v1250_v50  ;;  %v1350_v50 = vperm.slane %v2752_v59, 2  ;;  %v1655_v59 = vld [vmem:[#allocation14 + $0x70] sm:$0xff] }
 0x45d   :  { %v1274_v44 = vmul.f32 %v1818_v39, %v1273_v12  ;;  %1662 = vmatpush.msra.mxu3 %v1655_v59  ;;  %v1760_v59 = vld [vmem:[%s2800_s8] ss:$0 sm:$0xff]  ;;  %s1703_s8 = sshll.u32 %s2801_s9, 4  ;;  %s1704_s8 = int_to_ptr.hbm [resolvable:$true] %s1703_s8 }
 0x45e   :  { %v1252_v52 = vadd.f32 %v1816_v34, %v1251_v37 }
 0x45f   :  { %v1275_v8 = vadd.f32 %v1818_v39, %v1274_v44 }
 0x460   :  { %v1256_v4 = vsel %vm1255_vm10, %v1816_v34, %v1252_v52 }
 0x461   :  { %v1261_v6 = vsel %vm1258_vm11, %v1260_v60, %v1256_v4  ;;  %v1279_v63 = vsel %vm1278_vm14, %v1818_v39, %v1275_v8 }
 0x462   :  { %v1286_v11 = vmul.f32 %v1261_v6, %v1241_v0  ;;  %v1284_v41 = vsel %vm1281_vm15, %v1283_v2, %v1279_v63  ;;  %v1458_v6 = vrot.slane %v2755_v33, 2 }
 0x463   :  { %v1291_v3 = vsub.f32 1.0, %v1284_v41  ;;  %v1293_v43 = vmul.f32 %v1284_v41, %v2717_v29  ;;  %v1490_v29 = vld [vmem:[#allocation13 + $0xa8] sm:$0xff] }
 0x464   :  { %v1289_v38 = vadd.f32 %v1287_v14, %v1286_v11  ;;  %1533 = vmatpush.msra.mxu0 %v1490_v29  ;;  %v1652_v29 = vld [vmem:[#allocation14 + $0x58] sm:$0xff] }
 0x466   :  { %1819 = vtanh.f32 %v1289_v38  ;;  %1534 = vmatpush.msra.mxu0 %v1487_v35 }
 0x468   :  { %1535 = vmatpush.msra.mxu0 %v1484_v49  ;;  %v1648_v49 = vld [vmem:[#allocation14 + $0x38] sm:$0xff] }
 0x46a   :  { %1536 = vmatpush.msra.mxu0 %v1481_v61  ;;  %v1647_v61 = vld [vmem:[#allocation14 + $0x30] sm:$0xff] }
 0x46c   :  { %v1820_v19 = vpop.eup %1819  ;;  %1537 = vmatpush.msra.mxu0 %v1478_v5 }
 0x46d   :  { %v1292_v27 = vmul.f32 %v1820_v19, %v1291_v3 }
 0x46e   :  { %1538 = vmatpush.msra.mxu0 %v1475_v7 }
 0x46f   :  { %v2743_v45 = vadd.f32 %v1293_v43, %v1292_v27 }
 0x470   :  { %1539 = vmatpush.msra.mxu0 %v1472_v13  ;;  %v1645_v13 = vld [vmem:[#allocation14 + $0x20] sm:$0xff] }
 0x471   :  { %1295 = vst [vmem:[#allocation5 + $0x5] sm:$0x1] %v2743_v45  ;;  %1370 = vmatmul.f32.vlgmr.msrb.gmra.mxu1 %v2743_v45  ;;  %1390 = vmatmul.f32.vlgmr.msrb.gmra.mxu2 %v2743_v45 }
 0x472   :  { %1410 = vmatmul.f32.vlgmr.msrb.gmra.mxu3 %v2743_v45  ;;  %1540 = vmatpush.msra.mxu0 %v1469_v25  ;;  %v1643_v25 = vld [vmem:[#allocation14 + $0x10] sm:$0xff] }
 0x4ee   :  { %v1371_v20 = vpop.f32.mrf.mxu1 }
 0x4ef   :  { %v1372_v51 = vadd.f32 %v1371_v20, %v1348_v16  ;;  %v1654_v16 = vld [vmem:[#allocation14 + $0x68] sm:$0xff] }
 0x4f0   :  { %1663 = vmatpush.msra.mxu3 %v1654_v16 }
 0x4f1   :  { %v1414_v53 = vadd.f32 %v1372_v51, %v2755_v33  ;;  %v1653_v33 = vld [vmem:[#allocation14 + $0x60] sm:$0xff] }
 0x4f2   :  { %1664 = vmatpush.msra.mxu3 %v1653_v33 }
 0x4f3   :  { %v1746_v24 = vmul.f32 -1.442695, %v1414_v53 }
 0x4f4   :  { %v1391_v40 = vpop.f32.mrf.mxu2  ;;  %1665 = vmatpush.msra.mxu3 %v1652_v29 }
 0x4f5   :  { %1821 = vpow2.f32 %v1746_v24  ;;  %v1392_v17 = vadd.f32 %v1391_v40, %v1349_v56  ;;  %v1411_v37 = vpop.f32.mrf.mxu3  ;;  %v1651_v40 = vld [vmem:[#allocation14 + $0x50] sm:$0xff] }
 0x4f6   :  { %v1412_v60 = vadd.f32 %v1411_v37, %v1350_v50  ;;  %1666 = vmatpush.msra.mxu3 %v1651_v40 }
 0x4f7   :  { %v1437_v54 = vadd.f32 %v1435_v26, %v1392_v17  ;;  %v1650_v17 = vld [vmem:[#allocation14 + $0x48] sm:$0xff]  ;;  %v1649_v26 = vld [vmem:[#allocation14 + $0x40] sm:$0xff] }
 0x4f8   :  { %1667 = vmatpush.msra.mxu3 %v1650_v17 }
 0x4f9   :  { %v1747_v1 = vmul.f32 -1.442695, %v1437_v54 }
 0x4fa   :  { %1668 = vmatpush.msra.mxu3 %v1649_v26 }
 0x4fb   :  { %v1822_v9 = vpop.eup %1821  ;;  %1823 = vpow2.f32 %v1747_v1 }
 0x4fc   :  { %v1418_v15 = vadd.f32 1.0, %v1822_v9  ;;  %1669 = vmatpush.msra.mxu3 %v1648_v49  ;;  %v1646_v9 = vld [vmem:[#allocation14 + $0x28] sm:$0xff] }
 0x4fe   :  { %1825 = vrcp.f32 %v1418_v15  ;;  %v1430_v46 = vand.u32 2147483648, %v1418_v15  ;;  %v1428_v12 = vand.u32 2147483647, %v1418_v15  ;;  %vm1424_vm1 = vweird.f32 %v1418_v15  ;;  %1670 = vmatpush.msra.mxu3 %v1647_v61 }
 0x500   :  { %v1431_v44 = vor.u32 1.1754944e-38, %v1430_v46  ;;  %vm1429_vm3 = vcmp.eq.f32.partialorder %v1428_v12, 8.507059e+37  ;;  %1671 = vmatpush.msra.mxu3 %v1646_v9 }
 0x501   :  { %v1824_v36 = vpop.eup %1823 }
 0x502   :  { %v1441_v18 = vadd.f32 1.0, %v1824_v36  ;;  %1672 = vmatpush.msra.mxu3 %v1645_v13  ;;  %v1642_v36 = vld [vmem:[#allocation14 + $0x8] sm:$0xff] }
 0x504   :  { %v1826_v34 = vpop.eup %1825  ;;  %1827 = vrcp.f32 %v1441_v18  ;;  %v1453_v11 = vand.u32 2147483648, %v1441_v18  ;;  %v1451_v22 = vand.u32 2147483647, %v1441_v18  ;;  %vm1447_vm5 = vweird.f32 %v1441_v18 }
 0x505   :  { %v1420_v39 = vmul.f32 %v1826_v34, %v1418_v15  ;;  %vm1425_vm0 = vweird.f32 %v1826_v34  ;;  %v1644_v15 = vld [vmem:[#allocation14 + $0x18] sm:$0xff] }
 0x506   :  { %vm1426_vm2 = vmor %vm1424_vm1, %vm1425_vm0  ;;  %v1454_v63 = vor.u32 1.1754944e-38, %v1453_v11  ;;  %vm1452_vm7 = vcmp.eq.f32.partialorder %v1451_v22, 8.507059e+37  ;;  %1673 = vmatpush.msra.mxu3 %v1644_v15  ;;  %v1629_v22 = vrot.slane %v2776_v30, 2 }
 0x507   :  { %v1421_v42 = vsub.f32 1.0, %v1420_v39 }
 0x508   :  { %1674 = vmatpush.msra.mxu3 %v1643_v25 }
 0x509   :  { %v1422_v47 = vmul.f32 %v1826_v34, %v1421_v42  ;;  %v1641_v42 = vld [vmem:[#allocation14] sm:$0xff] }
 0x50a   :  { %v1828_v28 = vpop.eup %1827  ;;  %1675 = vmatpush.msra.mxu3 %v1642_v36 }
 0x50b   :  { %v1443_v48 = vmul.f32 %v1828_v28, %v1441_v18  ;;  %v1423_v23 = vadd.f32 %v1826_v34, %v1422_v47  ;;  %vm1448_vm4 = vweird.f32 %v1828_v28 }
 0x50c   :  { %vm1449_vm6 = vmor %vm1447_vm5, %vm1448_vm4  ;;  %1676 = vmatpush.msra.mxu3 %v1641_v42 }
 0x50d   :  { %v1444_v52 = vsub.f32 1.0, %v1443_v48  ;;  %v1427_v0 = vsel %vm1426_vm2, %v1826_v34, %v1423_v23 }
 0x50e   :  { %v1432_v4 = vsel %vm1429_vm3, %v1431_v44, %v1427_v0 }
 0x50f   :  { %v1445_v8 = vmul.f32 %v1828_v28, %v1444_v52  ;;  %v1457_v14 = vmul.f32 %v1432_v4, %v1412_v60 }
 0x511   :  { %v1446_v31 = vadd.f32 %v1828_v28, %v1445_v8  ;;  %v1460_v38 = vadd.f32 %v1458_v6, %v1457_v14 }
 0x513   :  { %v1450_v2 = vsel %vm1449_vm6, %v1828_v28, %v1446_v31  ;;  %1829 = vtanh.f32 %v1460_v38  ;;  %v1521_v28 = vperm.slane %v2772_v21, 2 }
 0x514   :  { %v1455_v41 = vsel %vm1452_vm7, %v1454_v63, %v1450_v2 }
 0x515   :  { %v1462_v3 = vsub.f32 1.0, %v1455_v41  ;;  %v1464_v43 = vmul.f32 %v1455_v41, %v2743_v45  ;;  %v1520_v45 = vperm.slane %v2772_v21, 1 }
 0x519   :  { %v1830_v19 = vpop.eup %1829 }
 0x51a   :  { %v1463_v27 = vmul.f32 %v1830_v19, %v1462_v3 }
 0x51c   :  { %v2763_v57 = vadd.f32 %v1464_v43, %v1463_v27 }
 0x51e   :  { %1466 = vst [vmem:[#allocation5 + $0x6] sm:$0x1] %v2763_v57  ;;  %1541 = vmatmul.f32.vlgmr.msra.gmra.mxu0 %v2763_v57  ;;  %1561 = vmatmul.f32.vlgmr.msra.gmra.mxu1 %v2763_v57 }
 0x51f   :  { %1581 = vmatmul.f32.vlgmr.msra.gmra.mxu2 %v2763_v57 }
 0x59b   :  { %v1542_v55 = vpop.f32.mrf.mxu0  ;;  %v1562_v62 = vpop.f32.mrf.mxu1 }
 0x59c   :  { %v1543_v20 = vadd.f32 %v1542_v55, %v1519_v10  ;;  %v1563_v51 = vadd.f32 %v1562_v62, %v1520_v45  ;;  %v1681_v10 = vlaneseq }
 0x59e   :  { %v1585_v53 = vadd.f32 %v1543_v20, %v2776_v30  ;;  %v1608_v56 = vadd.f32 %v1606_v32, %v1563_v51  ;;  %v1682_v45 = vand.u32 127, %v1681_v10 }
 0x5a0   :  { %v1748_v24 = vmul.f32 -1.442695, %v1585_v53  ;;  %v1749_v35 = vmul.f32 -1.442695, %v1608_v56  ;;  %vm1683_vm0 = vcmp.lt.s32.totalorder %v1682_v45, 64 }
 0x5a2   :  { %1831 = vpow2.f32 %v1748_v24  ;;  %v1582_v44 = vpop.f32.mrf.mxu2 }
 0x5a3   :  { %1833 = vpow2.f32 %v1749_v35  ;;  %v1583_v0 = vadd.f32 %v1582_v44, %v1521_v28 }
 0x5a8   :  { %v1832_v54 = vpop.eup %1831 }
 0x5a9   :  { %v1834_v1 = vpop.eup %1833  ;;  %v1589_v5 = vadd.f32 1.0, %v1832_v54 }
 0x5aa   :  { %v1612_v7 = vadd.f32 1.0, %v1834_v1 }
 0x5ab   :  { %1835 = vrcp.f32 %v1589_v5  ;;  %v1601_v12 = vand.u32 2147483648, %v1589_v5  ;;  %v1599_v48 = vand.u32 2147483647, %v1589_v5  ;;  %vm1595_vm9 = vweird.f32 %v1589_v5 }
 0x5ac   :  { %1837 = vrcp.f32 %v1612_v7  ;;  %v1624_v11 = vand.u32 2147483648, %v1612_v7  ;;  %vm1618_vm13 = vweird.f32 %v1612_v7  ;;  %v1622_v31 = vand.u32 2147483647, %v1612_v7 }
 0x5ad   :  { %v1602_v60 = vor.u32 1.1754944e-38, %v1601_v12  ;;  %vm1600_vm11 = vcmp.eq.f32.partialorder %v1599_v48, 8.507059e+37 }
 0x5ae   :  { %v1625_v2 = vor.u32 1.1754944e-38, %v1624_v11  ;;  %vm1623_vm15 = vcmp.eq.f32.partialorder %v1622_v31, 8.507059e+37 }
 0x5b1   :  { %v1836_v18 = vpop.eup %1835 }
 0x5b2   :  { %v1838_v34 = vpop.eup %1837  ;;  %v1591_v39 = vmul.f32 %v1836_v18, %v1589_v5  ;;  %vm1596_vm8 = vweird.f32 %v1836_v18 }
 0x5b3   :  { %v1614_v46 = vmul.f32 %v1838_v34, %v1612_v7  ;;  %vm1597_vm10 = vmor %vm1595_vm9, %vm1596_vm8  ;;  %vm1619_vm12 = vweird.f32 %v1838_v34 }
 0x5b4   :  { %v1592_v50 = vsub.f32 1.0, %v1591_v39  ;;  %vm1620_vm14 = vmor %vm1618_vm13, %vm1619_vm12 }
 0x5b5   :  { %v1615_v47 = vsub.f32 1.0, %v1614_v46 }
 0x5b6   :  { %v1593_v37 = vmul.f32 %v1836_v18, %v1592_v50 }
 0x5b7   :  { %v1616_v23 = vmul.f32 %v1838_v34, %v1615_v47 }
 0x5b8   :  { %v1594_v52 = vadd.f32 %v1836_v18, %v1593_v37 }
 0x5b9   :  { %v1617_v8 = vadd.f32 %v1838_v34, %v1616_v23 }
 0x5ba   :  { %v1598_v4 = vsel %vm1597_vm10, %v1836_v18, %v1594_v52 }
 0x5bb   :  { %v1603_v6 = vsel %vm1600_vm11, %v1602_v60, %v1598_v4  ;;  %v1621_v63 = vsel %vm1620_vm14, %v1838_v34, %v1617_v8 }
 0x5bc   :  { %v1628_v14 = vmul.f32 %v1603_v6, %v1583_v0  ;;  %v1626_v41 = vsel %vm1623_vm15, %v1625_v2, %v1621_v63 }
 0x5bd   :  { %v1633_v3 = vsub.f32 1.0, %v1626_v41  ;;  %v1635_v43 = vmul.f32 %v1626_v41, %v2763_v57 }
 0x5be   :  { %v1631_v38 = vadd.f32 %v1629_v22, %v1628_v14 }
 0x5c0   :  { %1839 = vtanh.f32 %v1631_v38 }
 0x5c6   :  { %v1840_v19 = vpop.eup %1839 }
 0x5c7   :  { %v1634_v27 = vmul.f32 %v1840_v19, %v1633_v3 }
 0x5c9   :  { %v1636_v21 = vadd.f32 %v1635_v43, %v1634_v27 }
 0x5cb   :  { %1637 = vst [vmem:[#allocation5 + $0x7] sm:$0x1] %v1636_v21 }
 0x5cc   :  { %1638 = vst [vmem:[#allocation2] sm:$0x1] %v1636_v21 }
 0x5cd   :  { %1639 = vst [vmem:[%s2802_s10] sm:$0x1] %v1636_v21  ;;  %s1996_s10 = smov [#allocation16]  }
 0x5ce   :  { %s1701_s27 = sshll.u32 %s1996_s10, 4  ;;  %s1702_s27 = int_to_ptr.vmem [resolvable:$true] %s1701_s27 }
 0x5d2   :  { %v1640_v58 = vld [vmem:[#allocation5] sm:$0xff] }
 0x5d3   :  { %1677 = vmatmul.f32.vlgmr.msra.gmra.mxu3 %v1640_v58 }
 0x656   :  { %v1678_v30 = vpop.f32.mrf.mxu3 }
 0x657   :  { %v1679_v16 = vadd.f32 %v1760_v59, %v1678_v30 }
 0x659   :  { %v1684_v55 = vsel %vm1683_vm0, %v1679_v16, -1e+30 }
 0x65a   :  { %1685 = vmax.xlane.f32.xlu0 %v1684_v55 }
 0x6cd   :  { %v1686_v57 = vpop.xlane.xlu0 %1685 }
 0x6ce   :  { %v1687_v62 = vsub.f32 %v1684_v55, %v1686_v57 }
 0x6d0   :  { %v1688_v20 = vmul.f32 1.442695, %v1687_v62 }
 0x6d2   :  { %1841 = vpow2.f32 %v1688_v20 }
 0x6d8   :  { %v1842_v51 = vpop.eup %1841 }
 0x6d9   :  { %1690 = vadd.xlane.f32.xlu0 %v1842_v51 }
 0x74c   :  { %v1691_v32 = vpop.xlane.xlu0 %1690 }
 0x74d   :  { %1843 = vlog2.f32 %v1691_v32 }
 0x753   :  { %v1844_v33 = vpop.eup %1843 }
 0x754   :  { %v1693_v53 = vmul.f32 0.6931472, %v1844_v33 }
 0x756   :  { %v1694_v56 = vsub.f32 %v1687_v62, %v1693_v53 }
 0x758   :  { %1695 = vst [vmem:[#allocation16] sm:$0xff] %v1694_v56 }
 0x759   :  { %1706 = dma.vmem_to_hbm [thread:$0]  %s1702_s27, 128, %s1704_s8, [#allocation10]  }
 0x75a   :  { %1985 = dma.done.wait [#allocation10], 128  }
 0x75b   :  { %1986 = vsyncadd [#allocation10], 4294967168 }
 0x75c   :  { %1715 = vsyncpa [#allocation9], 1 }
 0x75d   :  { %1716 = vsyncpa [#allocation12], 1 }
 0x75e   :  { %1717 = vsyncpa [#allocation15], 1 }
 0x75f   :  { %1718 = vsyncpa [#allocation10], 1 }

</bundles_post_ra>
